<compile_context>
chip_gen: v6e
topology: v6e:2x2x1
jax: 0.10.0
libtpu: 0.0.40
codegen_flags: <defaults>
</compile_context>

<pallas_src>
import math
import numpy as np
import jax
import jax.numpy as jnp
from jax import lax
from jax.experimental import pallas as pl
from jax.experimental.pallas import tpu as pltpu

# ---- hyperparameters (stand-ins for hp.*, kept small) ----
MEL_DIM = 16        # hp.mel_dim
HIDDEN = 32         # hp.encoder_hidden
N_LAYERS = 2        # hp.encoder_layer
N_HEAD = 2          # hp.encoder_head
D_K = HIDDEN // N_HEAD
D_INNER = 64        # hp.fft_conv1d_filter_size
MAX_SEQ_LEN = 16    # hp.max_seq_len

B = 4               # batch (demo)
T = 8               # sequence length (demo)
B_TILE = 2          # utterances per grid step (row tile = B_TILE * T rows)
R = B_TILE * T      # rows per kernel invocation

NEG_INF = -1e9      # additive key-padding bias (padded query rows are zeroed by `keep`)
MM_DTYPE = jnp.bfloat16   # matmul-operand dtype (f32 accumulation everywhere)


def get_sinusoid_encoding_table(n_position, d_hid):
    """Exact numpy port of the PyTorch helper."""
    def cal_angle(position, hid_idx):
        return position / np.power(10000, 2 * (hid_idx // 2) / d_hid)
    table = np.array(
        [[cal_angle(pos, j) for j in range(d_hid)] for pos in range(n_position)],
        dtype=np.float64)
    table[:, 0::2] = np.sin(table[:, 0::2])
    table[:, 1::2] = np.cos(table[:, 1::2])
    return table.astype(np.float32)


def _layer_norm(x, g, b):
    # centered variance (robust to large-magnitude activations)
    mu = jnp.mean(x, axis=-1, keepdims=True)
    xc = x - mu
    var = jnp.mean(xc * xc, axis=-1, keepdims=True)
    return xc * lax.rsqrt(var + 1e-5) * g + b


# --------------------------- Pallas kernel ---------------------------
def encoder2_kernel(src_ref, keep_ref, bias_ref, pos_ref,
                    wlin_ref, blin_ref,
                    wqkv_ref, bqkv_ref, wo_ref, bo_ref,
                    ln1g_ref, ln1b_ref,
                    w1_ref, b1_ref, w2_ref, b2_ref,
                    ln2g_ref, ln2b_ref,
                    out_ref):
    x = src_ref[...]                         # (R, MEL_DIM)  f32
    keep = keep_ref[...]                     # (R, HIDDEN)   pre-broadcast row mask
    # additive key-padding bias, folded over heads ONCE per invocation:
    # (B_TILE*N_HEAD, T, T), head-major outer ordering (matches q/k/v fold below)
    attn_bias = jnp.concatenate([bias_ref[...]] * N_HEAD, axis=0)

    # input projection + positional encoding (pos pre-tiled to (R, HIDDEN))
    h = jnp.dot(x.astype(MM_DTYPE), wlin_ref[...],
                preferred_element_type=jnp.float32) + blin_ref[...]
    h = h + pos_ref[...]

    for l in range(N_LAYERS):                # static unroll over FFT blocks
        # ----- multi-head self attention (post-LN, residual) -----
        residual = h
        # fused QKV: one (R, H) @ (H, 3H) matmul; 1/sqrt(d_k) already folded into Wq/bq
        qkv = jnp.dot(h.astype(MM_DTYPE), wqkv_ref[l],
                      preferred_element_type=jnp.float32) + bqkv_ref[l]
        qkv3 = qkv.reshape(B_TILE, T, 3 * HIDDEN)

        # fold heads into the batch axis -> (B_TILE*N_HEAD, T, D_K), head-major
        def fold(base):
            return jnp.concatenate(
                [qkv3[:, :, base + hd * D_K: base + (hd + 1) * D_K]
                 for hd in range(N_HEAD)], axis=0)
        q = fold(0)
        k = fold(HIDDEN)
        v = fold(2 * HIDDEN)

        # single batched score matmul + softmax + context matmul per layer
        scores = jnp.einsum('bqd,bkd->bqk', q.astype(MM_DTYPE), k.astype(MM_DTYPE),
                            preferred_element_type=jnp.float32)
        scores = scores + attn_bias
        scores = scores - jnp.max(scores, axis=-1, keepdims=True)
        p = jnp.exp(scores)
        attn = p / jnp.sum(p, axis=-1, keepdims=True)          # exact reciprocal
        ctx = jnp.einsum('bqk,bkd->bqd', attn.astype(MM_DTYPE), v.astype(MM_DTYPE),
                         preferred_element_type=jnp.float32)    # (B_TILE*NH, T, D_K)

        # re-join heads on the lane axis (intra-vreg concat), single output projection
        ctx2 = jnp.concatenate(
            [ctx[hd * B_TILE:(hd + 1) * B_TILE].reshape(R, D_K)
             for hd in range(N_HEAD)], axis=-1)                  # (R, HIDDEN)
        o = jnp.dot(ctx2.astype(MM_DTYPE), wo_ref[l],
                    preferred_element_type=jnp.float32) + bo_ref[l]
        h = _layer_norm(o + residual, ln1g_ref[l], ln1b_ref[l]) * keep

        # ----- position-wise feed forward -----
        # TODO(synk): original avatron FFTBlock uses Conv1d with hp.fft_conv1d_kernel
        # (unavailable here); pointwise (kernel_size=1) convs == linears are used.
        residual = h
        f = jnp.dot(h.astype(MM_DTYPE), w1_ref[l],
                    preferred_element_type=jnp.float32) + b1_ref[l]
        f = jnp.maximum(f, 0.0)
        f = jnp.dot(f.astype(MM_DTYPE), w2_ref[l],
                    preferred_element_type=jnp.float32) + b2_ref[l]
        h = _layer_norm(f + residual, ln2g_ref[l], ln2b_ref[l]) * keep

    out_ref[...] = h


# --------------------------- wrapper ---------------------------
def pack_params(params):
    """One-time packing (weight concat, scale folding, bf16 cast, pos tiling)."""
    inv_sqrt_dk = 1.0 / math.sqrt(D_K)
    wqkv = jnp.concatenate(
        [params["wq"] * inv_sqrt_dk, params["wk"], params["wv"]], axis=2)   # (L,H,3H)
    bqkv = jnp.concatenate(
        [params["bq"] * inv_sqrt_dk, params["bk"], params["bv"]], axis=1)   # (L,3H)
    L = N_LAYERS
    return {
        "pos":  jnp.tile(params["pos_enc"][:T], (B_TILE, 1)),               # (R, H) f32
        "wlin": params["w_lin"].astype(MM_DTYPE),
        "blin": params["b_lin"].reshape(1, HIDDEN),
        "wqkv": wqkv.astype(MM_DTYPE),
        "bqkv": bqkv.reshape(L, 1, 3 * HIDDEN),
        "wo":   params["wo"].astype(MM_DTYPE),
        "bo":   params["bo"].reshape(L, 1, HIDDEN),
        "ln1g": params["ln1_g"].reshape(L, 1, HIDDEN),
        "ln1b": params["ln1_b"].reshape(L, 1, HIDDEN),
        "w1":   params["w1"].astype(MM_DTYPE),
        "b1":   params["b1"].reshape(L, 1, D_INNER),
        "w2":   params["w2"].astype(MM_DTYPE),
        "b2":   params["b2"].reshape(L, 1, HIDDEN),
        "ln2g": params["ln2_g"].reshape(L, 1, HIDDEN),
        "ln2b": params["ln2_b"].reshape(L, 1, HIDDEN),
    }


def encoder2_forward(src_seq, mask_f, packed):
    b, t, m = src_seq.shape
    assert t == T and m == MEL_DIM and b % B_TILE == 0

    # input-dependent mask packing (pre-broadcast so the kernel never rebuilds them)
    src_flat = src_seq.reshape(b * t, m)
    keep = jnp.broadcast_to((1.0 - mask_f).reshape(b * t, 1), (b * t, HIDDEN))
    attn_bias = jnp.broadcast_to((mask_f * NEG_INF)[:, None, :], (b, t, t))

    vmem = pltpu.MemorySpace.VMEM

    def full_spec(a):  # whole array resident in VMEM, same block every grid step
        return pl.BlockSpec(a.shape, lambda i: (0,) * a.ndim, memory_space=vmem)

    in_specs = [
        pl.BlockSpec((R, MEL_DIM), lambda i: (i, 0), memory_space=vmem),      # src
        pl.BlockSpec((R, HIDDEN), lambda i: (i, 0), memory_space=vmem),       # keep
        pl.BlockSpec((B_TILE, T, T), lambda i: (i, 0, 0), memory_space=vmem),  # bias
        full_spec(packed["pos"]),
        full_spec(packed["wlin"]), full_spec(packed["blin"]),
        full_spec(packed["wqkv"]), full_spec(packed["bqkv"]),
        full_spec(packed["wo"]), full_spec(packed["bo"]),
        full_spec(packed["ln1g"]), full_spec(packed["ln1b"]),
        full_spec(packed["w1"]), full_spec(packed["b1"]),
        full_spec(packed["w2"]), full_spec(packed["b2"]),
        full_spec(packed["ln2g"]), full_spec(packed["ln2b"]),
    ]

    out = pl.pallas_call(
        encoder2_kernel,
        grid=(b // B_TILE,),
        in_specs=in_specs,
        out_specs=pl.BlockSpec((R, HIDDEN), lambda i: (i, 0), memory_space=vmem),
        out_shape=jax.ShapeDtypeStruct((b * t, HIDDEN), jnp.float32),
        compiler_params=pltpu.CompilerParams(
            dimension_semantics=("parallel",)),   # v7x: split row tiles across 2 TCs
    )(src_flat, keep, attn_bias, packed["pos"], packed["wlin"], packed["blin"],
      packed["wqkv"], packed["bqkv"], packed["wo"], packed["bo"],
      packed["ln1g"], packed["ln1b"], packed["w1"], packed["b1"],
      packed["w2"], packed["b2"], packed["ln2g"], packed["ln2b"])
    return out.reshape(b, t, HIDDEN)


encoder2_forward_jit = jax.jit(encoder2_forward)


# ------------------- pure-JAX f32 reference for validation -------------------
def encoder2_reference(src_seq, mask_f, params):
    pos = params["pos_enc"][:src_seq.shape[1]]
    key_mask = mask_f[:, None, :]
    keep = (1.0 - mask_f)[:, :, None]
    h = src_seq @ params["w_lin"] + params["b_lin"] + pos[None]
    for l in range(N_LAYERS):
        residual = h
        q = h @ params["wq"][l] + params["bq"][l]
        k = h @ params["wk"][l] + params["bk"][l]
        v = h @ params["wv"][l] + params["bv"][l]
        heads = []
        for hd in range(N_HEAD):
            sl = slice(hd * D_K, (hd + 1) * D_K)
            qh, kh, vh = q[..., sl], k[..., sl], v[..., sl]
            scores = jnp.einsum('btd,bsd->bts', qh, kh) / math.sqrt(D_K)
            scores = jnp.where(key_mask > 0.5, NEG_INF, scores)
            attn = jax.nn.softmax(scores, axis=-1)
            heads.append(jnp.einsum('bts,bsd->btd', attn, vh))
        o = jnp.concatenate(heads, -1) @ params["wo"][l] + params["bo"][l]
        h = _layer_norm(o + residual, params["ln1_g"][l], params["ln1_b"][l]) * keep
        residual = h
        f = jax.nn.relu(h @ params["w1"][l] + params["b1"][l])
        f = f @ params["w2"][l] + params["b2"][l]
        h = _layer_norm(f + residual, params["ln2_g"][l], params["ln2_b"][l]) * keep
    return h


def init_params(key):
    ks = jax.random.split(key, 16)
    s = 0.1
    return {
        "w_lin": s * jax.random.normal(ks[0], (MEL_DIM, HIDDEN), jnp.float32),
        "b_lin": s * jax.random.normal(ks[1], (HIDDEN,), jnp.float32),
        "pos_enc": jnp.asarray(get_sinusoid_encoding_table(MAX_SEQ_LEN + 1, HIDDEN)),
        "wq": s * jax.random.normal(ks[2], (N_LAYERS, HIDDEN, HIDDEN), jnp.float32),
        "bq": jnp.zeros((N_LAYERS, HIDDEN), jnp.float32),
        "wk": s * jax.random.normal(ks[3], (N_LAYERS, HIDDEN, HIDDEN), jnp.float32),
        "bk": jnp.zeros((N_LAYERS, HIDDEN), jnp.float32),
        "wv": s * jax.random.normal(ks[4], (N_LAYERS, HIDDEN, HIDDEN), jnp.float32),
        "bv": jnp.zeros((N_LAYERS, HIDDEN), jnp.float32),
        "wo": s * jax.random.normal(ks[5], (N_LAYERS, HIDDEN, HIDDEN), jnp.float32),
        "bo": s * jax.random.normal(ks[6], (N_LAYERS, HIDDEN), jnp.float32),
        "ln1_g": jnp.ones((N_LAYERS, HIDDEN), jnp.float32),
        "ln1_b": jnp.zeros((N_LAYERS, HIDDEN), jnp.float32),
        "w1": s * jax.random.normal(ks[7], (N_LAYERS, HIDDEN, D_INNER), jnp.float32),
        "b1": s * jax.random.normal(ks[8], (N_LAYERS, D_INNER), jnp.float32),
        "w2": s * jax.random.normal(ks[9], (N_LAYERS, D_INNER, HIDDEN), jnp.float32),
        "b2": s * jax.random.normal(ks[10], (N_LAYERS, HIDDEN), jnp.float32),
        "ln2_g": jnp.ones((N_LAYERS, HIDDEN), jnp.float32),
        "ln2_b": jnp.zeros((N_LAYERS, HIDDEN), jnp.float32),
    }


if __name__ == "__main__":
    key = jax.random.PRNGKey(0)
    k_x, k_p = jax.random.split(key)
    params = init_params(k_p)
    packed = pack_params(params)          # one-time weight packing / bf16 casts

    src_seq = jax.random.normal(k_x, (B, T, MEL_DIM), jnp.float32)
    lengths = jnp.array([T, 5, 6, 3], dtype=jnp.int32)            # per-batch valid lengths
    mask_f = (jnp.arange(T)[None, :] >= lengths[:, None]).astype(jnp.float32)  # 1.0 == pad

    out = jax.block_until_ready(encoder2_forward_jit(src_seq, mask_f, packed))
    ref = jax.block_until_ready(encoder2_reference(src_seq, mask_f, params))

    # Tolerance sized for bf16 matmul operands (f32 accumulation) across 2 layers;
    # element-wise math is exact f32.  Set MM_DTYPE=jnp.float32 for a tighter check.
    np.testing.assert_allclose(np.asarray(out), np.asarray(ref), rtol=2e-2, atol=2e-2)

    print("KERNEL_OK")
</pallas_src>

<mosaic_0001>
module attributes {stable_mosaic.version = 11 : i64} {
  func.func @encoder2_kernel(%arg0: i32, %arg1: memref<16x16xf32, #tpu.memory_space<vmem>>, %arg2: memref<16x32xf32, #tpu.memory_space<vmem>>, %arg3: memref<2x8x8xf32, #tpu.memory_space<vmem>>, %arg4: memref<16x32xf32, #tpu.memory_space<vmem>>, %arg5: memref<16x32xbf16, #tpu.memory_space<vmem>>, %arg6: memref<1x32xf32, #tpu.memory_space<vmem>>, %arg7: memref<2x32x96xbf16, #tpu.memory_space<vmem>>, %arg8: memref<2x1x96xf32, #tpu.memory_space<vmem>>, %arg9: memref<2x32x32xbf16, #tpu.memory_space<vmem>>, %arg10: memref<2x1x32xf32, #tpu.memory_space<vmem>>, %arg11: memref<2x1x32xf32, #tpu.memory_space<vmem>>, %arg12: memref<2x1x32xf32, #tpu.memory_space<vmem>>, %arg13: memref<2x32x64xbf16, #tpu.memory_space<vmem>>, %arg14: memref<2x1x64xf32, #tpu.memory_space<vmem>>, %arg15: memref<2x64x32xbf16, #tpu.memory_space<vmem>>, %arg16: memref<2x1x32xf32, #tpu.memory_space<vmem>>, %arg17: memref<2x1x32xf32, #tpu.memory_space<vmem>>, %arg18: memref<2x1x32xf32, #tpu.memory_space<vmem>>, %arg19: memref<16x32xf32, #tpu.memory_space<vmem>>) attributes {dimension_semantics = [#tpu.dimension_semantics<parallel>], iteration_bounds = array<i64: 2>, scalar_prefetch = 0 : i64, scratch_operands = 0 : i64, tpu.core_type = #tpu.core_type<tc>, window_params = [{transform_indices = @transform_0, window_bounds = array<i64: 16, 16>}, {transform_indices = @transform_1, window_bounds = array<i64: 16, 32>}, {transform_indices = @transform_2, window_bounds = array<i64: 2, 8, 8>}, {pipeline_mode = #tpu.pipeline_mode<synchronous>, transform_indices = @transform_3, window_bounds = array<i64: 16, 32>}, {pipeline_mode = #tpu.pipeline_mode<synchronous>, transform_indices = @transform_4, window_bounds = array<i64: 16, 32>}, {pipeline_mode = #tpu.pipeline_mode<synchronous>, transform_indices = @transform_5, window_bounds = array<i64: 1, 32>}, {pipeline_mode = #tpu.pipeline_mode<synchronous>, transform_indices = @transform_6, window_bounds = array<i64: 2, 32, 96>}, {pipeline_mode = #tpu.pipeline_mode<synchronous>, transform_indices = @transform_7, window_bounds = array<i64: 2, 1, 96>}, {pipeline_mode = #tpu.pipeline_mode<synchronous>, transform_indices = @transform_8, window_bounds = array<i64: 2, 32, 32>}, {pipeline_mode = #tpu.pipeline_mode<synchronous>, transform_indices = @transform_9, window_bounds = array<i64: 2, 1, 32>}, {pipeline_mode = #tpu.pipeline_mode<synchronous>, transform_indices = @transform_10, window_bounds = array<i64: 2, 1, 32>}, {pipeline_mode = #tpu.pipeline_mode<synchronous>, transform_indices = @transform_11, window_bounds = array<i64: 2, 1, 32>}, {pipeline_mode = #tpu.pipeline_mode<synchronous>, transform_indices = @transform_12, window_bounds = array<i64: 2, 32, 64>}, {pipeline_mode = #tpu.pipeline_mode<synchronous>, transform_indices = @transform_13, window_bounds = array<i64: 2, 1, 64>}, {pipeline_mode = #tpu.pipeline_mode<synchronous>, transform_indices = @transform_14, window_bounds = array<i64: 2, 64, 32>}, {pipeline_mode = #tpu.pipeline_mode<synchronous>, transform_indices = @transform_15, window_bounds = array<i64: 2, 1, 32>}, {pipeline_mode = #tpu.pipeline_mode<synchronous>, transform_indices = @transform_16, window_bounds = array<i64: 2, 1, 32>}, {pipeline_mode = #tpu.pipeline_mode<synchronous>, transform_indices = @transform_17, window_bounds = array<i64: 2, 1, 32>}, {transform_indices = @transform_18, window_bounds = array<i64: 16, 32>}]} {
    %c0 = arith.constant 0 : index
    %c0_0 = arith.constant 0 : index
    %0 = vector.load %arg1[%c0, %c0_0] : memref<16x16xf32, #tpu.memory_space<vmem>>, vector<16x16xf32>
    %c0_1 = arith.constant 0 : index
    %c0_2 = arith.constant 0 : index
    %1 = vector.load %arg2[%c0_1, %c0_2] : memref<16x32xf32, #tpu.memory_space<vmem>>, vector<16x32xf32>
    %c0_3 = arith.constant 0 : index
    %c0_4 = arith.constant 0 : index
    %c0_5 = arith.constant 0 : index
    %2 = vector.load %arg3[%c0_3, %c0_4, %c0_5] : memref<2x8x8xf32, #tpu.memory_space<vmem>>, vector<2x8x8xf32>
    %3 = tpu.concatenate %2, %2 in 0 : vector<2x8x8xf32>, vector<2x8x8xf32> -> vector<4x8x8xf32>
    %4 = arith.truncf %0 : vector<16x16xf32> to vector<16x16xbf16>
    %c0_6 = arith.constant 0 : index
    %c0_7 = arith.constant 0 : index
    %5 = vector.load %arg5[%c0_6, %c0_7] : memref<16x32xbf16, #tpu.memory_space<vmem>>, vector<16x32xbf16>
    %cst = arith.constant dense<0.000000e+00> : vector<16x32xf32>
    %6 = tpu.matmul %4, %5, %cst {dimension_numbers = #tpu.dot_dimension_numbers<[1], [0], [0], [1], [0, 0, 1, 1], [], []>} : vector<16x16xbf16>, vector<16x32xbf16>, vector<16x32xf32> -> vector<16x32xf32>
    %c0_8 = arith.constant 0 : index
    %c0_9 = arith.constant 0 : index
    %7 = vector.load %arg6[%c0_8, %c0_9] : memref<1x32xf32, #tpu.memory_space<vmem>>, vector<1x32xf32>
    %8 = vector.broadcast %7 : vector<1x32xf32> to vector<16x32xf32>
    %9 = arith.addf %6, %8 : vector<16x32xf32>
    %c0_10 = arith.constant 0 : index
    %c0_11 = arith.constant 0 : index
    %10 = vector.load %arg4[%c0_10, %c0_11] : memref<16x32xf32, #tpu.memory_space<vmem>>, vector<16x32xf32>
    %11 = arith.addf %9, %10 : vector<16x32xf32>
    %12 = arith.truncf %11 : vector<16x32xf32> to vector<16x32xbf16>
    %c0_12 = arith.constant 0 : index
    %c0_13 = arith.constant 0 : index
    %c0_14 = arith.constant 0 : index
    %13 = vector.load %arg7[%c0_12, %c0_13, %c0_14] : memref<2x32x96xbf16, #tpu.memory_space<vmem>>, vector<1x32x96xbf16>
    %14 = vector.shape_cast %13 : vector<1x32x96xbf16> to vector<32x96xbf16>
    %cst_15 = arith.constant dense<0.000000e+00> : vector<16x96xf32>
    %15 = tpu.matmul %12, %14, %cst_15 {dimension_numbers = #tpu.dot_dimension_numbers<[1], [0], [0], [1], [0, 0, 1, 1], [], []>} : vector<16x32xbf16>, vector<32x96xbf16>, vector<16x96xf32> -> vector<16x96xf32>
    %c0_16 = arith.constant 0 : index
    %c0_17 = arith.constant 0 : index
    %c0_18 = arith.constant 0 : index
    %16 = vector.load %arg8[%c0_16, %c0_17, %c0_18] : memref<2x1x96xf32, #tpu.memory_space<vmem>>, vector<1x1x96xf32>
    %17 = vector.shape_cast %16 : vector<1x1x96xf32> to vector<1x96xf32>
    %18 = vector.broadcast %17 : vector<1x96xf32> to vector<16x96xf32>
    %19 = arith.addf %15, %18 : vector<16x96xf32>
    %20 = vector.shape_cast %19 : vector<16x96xf32> to vector<2x8x96xf32>
    %21 = vector.extract_strided_slice %20 {offsets = [0, 0, 0], sizes = [2, 8, 16], strides = [1, 1, 1]} : vector<2x8x96xf32> to vector<2x8x16xf32>
    %22 = vector.extract_strided_slice %20 {offsets = [0, 0, 16], sizes = [2, 8, 16], strides = [1, 1, 1]} : vector<2x8x96xf32> to vector<2x8x16xf32>
    %23 = tpu.concatenate %21, %22 in 0 : vector<2x8x16xf32>, vector<2x8x16xf32> -> vector<4x8x16xf32>
    %24 = vector.extract_strided_slice %20 {offsets = [0, 0, 32], sizes = [2, 8, 16], strides = [1, 1, 1]} : vector<2x8x96xf32> to vector<2x8x16xf32>
    %25 = vector.extract_strided_slice %20 {offsets = [0, 0, 48], sizes = [2, 8, 16], strides = [1, 1, 1]} : vector<2x8x96xf32> to vector<2x8x16xf32>
    %26 = tpu.concatenate %24, %25 in 0 : vector<2x8x16xf32>, vector<2x8x16xf32> -> vector<4x8x16xf32>
    %27 = vector.extract_strided_slice %20 {offsets = [0, 0, 64], sizes = [2, 8, 16], strides = [1, 1, 1]} : vector<2x8x96xf32> to vector<2x8x16xf32>
    %28 = vector.extract_strided_slice %20 {offsets = [0, 0, 80], sizes = [2, 8, 16], strides = [1, 1, 1]} : vector<2x8x96xf32> to vector<2x8x16xf32>
    %29 = tpu.concatenate %27, %28 in 0 : vector<2x8x16xf32>, vector<2x8x16xf32> -> vector<4x8x16xf32>
    %30 = arith.truncf %23 : vector<4x8x16xf32> to vector<4x8x16xbf16>
    %31 = arith.truncf %26 : vector<4x8x16xf32> to vector<4x8x16xbf16>
    "tpu.trace_start"() <{level = 10 : i32, message = "bqd,bkd->bqk"}> : () -> ()
    %cst_19 = arith.constant dense<0.000000e+00> : vector<4x8x8xf32>
    %32 = tpu.matmul %30, %31, %cst_19 {dimension_numbers = #tpu.dot_dimension_numbers<[2], [2], [1], [1], [0, 0, 0, 1, 1, 1], [0], [0]>} : vector<4x8x16xbf16>, vector<4x8x16xbf16>, vector<4x8x8xf32> -> vector<4x8x8xf32>
    "tpu.trace_stop"() : () -> ()
    %33 = arith.addf %32, %3 : vector<4x8x8xf32>
    %cst_20 = arith.constant dense<0xFF800000> : vector<4x8xf32>
    %34 = vector.multi_reduction <maximumf>, %33, %cst_20 [2] : vector<4x8x8xf32> to vector<4x8xf32>
    %35 = vector.shape_cast %34 : vector<4x8xf32> to vector<4x8x1xf32>
    %36 = vector.broadcast %35 : vector<4x8x1xf32> to vector<4x8x8xf32>
    %37 = arith.subf %33, %36 : vector<4x8x8xf32>
    %38 = math.exp %37 : vector<4x8x8xf32>
    %cst_21 = arith.constant dense<0.000000e+00> : vector<4x8xf32>
    %39 = vector.multi_reduction <add>, %38, %cst_21 [2] : vector<4x8x8xf32> to vector<4x8xf32>
    %40 = vector.shape_cast %39 : vector<4x8xf32> to vector<4x8x1xf32>
    %41 = vector.broadcast %40 : vector<4x8x1xf32> to vector<4x8x8xf32>
    %42 = arith.divf %38, %41 : vector<4x8x8xf32>
    %43 = arith.truncf %42 : vector<4x8x8xf32> to vector<4x8x8xbf16>
    %44 = arith.truncf %29 : vector<4x8x16xf32> to vector<4x8x16xbf16>
    "tpu.trace_start"() <{level = 10 : i32, message = "bqk,bkd->bqd"}> : () -> ()
    %cst_22 = arith.constant dense<0.000000e+00> : vector<4x8x16xf32>
    %45 = tpu.matmul %43, %44, %cst_22 {dimension_numbers = #tpu.dot_dimension_numbers<[2], [1], [1], [2], [0, 0, 0, 1, 1, 2], [0], [0]>} : vector<4x8x8xbf16>, vector<4x8x16xbf16>, vector<4x8x16xf32> -> vector<4x8x16xf32>
    "tpu.trace_stop"() : () -> ()
    %46 = vector.extract_strided_slice %45 {offsets = [0, 0, 0], sizes = [2, 8, 16], strides = [1, 1, 1]} : vector<4x8x16xf32> to vector<2x8x16xf32>
    %47 = vector.shape_cast %46 : vector<2x8x16xf32> to vector<16x16xf32>
    %48 = vector.extract_strided_slice %45 {offsets = [2, 0, 0], sizes = [2, 8, 16], strides = [1, 1, 1]} : vector<4x8x16xf32> to vector<2x8x16xf32>
    %49 = vector.shape_cast %48 : vector<2x8x16xf32> to vector<16x16xf32>
    %50 = tpu.concatenate %47, %49 in 1 : vector<16x16xf32>, vector<16x16xf32> -> vector<16x32xf32>
    %51 = arith.truncf %50 : vector<16x32xf32> to vector<16x32xbf16>
    %c0_23 = arith.constant 0 : index
    %c0_24 = arith.constant 0 : index
    %c0_25 = arith.constant 0 : index
    %52 = vector.load %arg9[%c0_23, %c0_24, %c0_25] : memref<2x32x32xbf16, #tpu.memory_space<vmem>>, vector<1x32x32xbf16>
    %53 = vector.shape_cast %52 : vector<1x32x32xbf16> to vector<32x32xbf16>
    %cst_26 = arith.constant dense<0.000000e+00> : vector<16x32xf32>
    %54 = tpu.matmul %51, %53, %cst_26 {dimension_numbers = #tpu.dot_dimension_numbers<[1], [0], [0], [1], [0, 0, 1, 1], [], []>} : vector<16x32xbf16>, vector<32x32xbf16>, vector<16x32xf32> -> vector<16x32xf32>
    %c0_27 = arith.constant 0 : index
    %c0_28 = arith.constant 0 : index
    %c0_29 = arith.constant 0 : index
    %55 = vector.load %arg10[%c0_27, %c0_28, %c0_29] : memref<2x1x32xf32, #tpu.memory_space<vmem>>, vector<1x1x32xf32>
    %56 = vector.shape_cast %55 : vector<1x1x32xf32> to vector<1x32xf32>
    %57 = vector.broadcast %56 : vector<1x32xf32> to vector<16x32xf32>
    %58 = arith.addf %54, %57 : vector<16x32xf32>
    %59 = arith.addf %58, %11 : vector<16x32xf32>
    %c0_30 = arith.constant 0 : index
    %c0_31 = arith.constant 0 : index
    %c0_32 = arith.constant 0 : index
    %60 = vector.load %arg11[%c0_30, %c0_31, %c0_32] : memref<2x1x32xf32, #tpu.memory_space<vmem>>, vector<1x1x32xf32>
    %61 = vector.shape_cast %60 : vector<1x1x32xf32> to vector<1x32xf32>
    %c0_33 = arith.constant 0 : index
    %c0_34 = arith.constant 0 : index
    %c0_35 = arith.constant 0 : index
    %62 = vector.load %arg12[%c0_33, %c0_34, %c0_35] : memref<2x1x32xf32, #tpu.memory_space<vmem>>, vector<1x1x32xf32>
    %63 = vector.shape_cast %62 : vector<1x1x32xf32> to vector<1x32xf32>
    %cst_36 = arith.constant dense<0.000000e+00> : vector<16xf32>
    %64 = vector.multi_reduction <add>, %59, %cst_36 [1] : vector<16x32xf32> to vector<16xf32>
    %65 = vector.shape_cast %64 : vector<16xf32> to vector<16x1xf32>
    %cst_37 = arith.constant 3.200000e+01 : f32
    %66 = vector.broadcast %cst_37 : f32 to vector<16x1xf32>
    %67 = arith.divf %65, %66 : vector<16x1xf32>
    %68 = vector.broadcast %67 : vector<16x1xf32> to vector<16x32xf32>
    %69 = arith.subf %59, %68 : vector<16x32xf32>
    %70 = arith.mulf %69, %69 : vector<16x32xf32>
    %cst_38 = arith.constant dense<0.000000e+00> : vector<16xf32>
    %71 = vector.multi_reduction <add>, %70, %cst_38 [1] : vector<16x32xf32> to vector<16xf32>
    %72 = vector.shape_cast %71 : vector<16xf32> to vector<16x1xf32>
    %cst_39 = arith.constant 3.200000e+01 : f32
    %73 = vector.broadcast %cst_39 : f32 to vector<16x1xf32>
    %74 = arith.divf %72, %73 : vector<16x1xf32>
    %cst_40 = arith.constant 9.99999974E-6 : f32
    %75 = vector.broadcast %cst_40 : f32 to vector<16x1xf32>
    %76 = arith.addf %74, %75 : vector<16x1xf32>
    %77 = math.rsqrt %76 : vector<16x1xf32>
    %78 = vector.broadcast %77 : vector<16x1xf32> to vector<16x32xf32>
    %79 = arith.mulf %69, %78 : vector<16x32xf32>
    %80 = vector.broadcast %61 : vector<1x32xf32> to vector<16x32xf32>
    %81 = arith.mulf %79, %80 : vector<16x32xf32>
    %82 = vector.broadcast %63 : vector<1x32xf32> to vector<16x32xf32>
    %83 = arith.addf %81, %82 : vector<16x32xf32>
    %84 = arith.mulf %83, %1 : vector<16x32xf32>
    %85 = arith.truncf %84 : vector<16x32xf32> to vector<16x32xbf16>
    %c0_41 = arith.constant 0 : index
    %c0_42 = arith.constant 0 : index
    %c0_43 = arith.constant 0 : index
    %86 = vector.load %arg13[%c0_41, %c0_42, %c0_43] : memref<2x32x64xbf16, #tpu.memory_space<vmem>>, vector<1x32x64xbf16>
    %87 = vector.shape_cast %86 : vector<1x32x64xbf16> to vector<32x64xbf16>
    %cst_44 = arith.constant dense<0.000000e+00> : vector<16x64xf32>
    %88 = tpu.matmul %85, %87, %cst_44 {dimension_numbers = #tpu.dot_dimension_numbers<[1], [0], [0], [1], [0, 0, 1, 1], [], []>} : vector<16x32xbf16>, vector<32x64xbf16>, vector<16x64xf32> -> vector<16x64xf32>
    %c0_45 = arith.constant 0 : index
    %c0_46 = arith.constant 0 : index
    %c0_47 = arith.constant 0 : index
    %89 = vector.load %arg14[%c0_45, %c0_46, %c0_47] : memref<2x1x64xf32, #tpu.memory_space<vmem>>, vector<1x1x64xf32>
    %90 = vector.shape_cast %89 : vector<1x1x64xf32> to vector<1x64xf32>
    %91 = vector.broadcast %90 : vector<1x64xf32> to vector<16x64xf32>
    %92 = arith.addf %88, %91 : vector<16x64xf32>
    %cst_48 = arith.constant 0.000000e+00 : f32
    %93 = vector.broadcast %cst_48 : f32 to vector<16x64xf32>
    %94 = arith.maximumf %92, %93 : vector<16x64xf32>
    %95 = arith.truncf %94 : vector<16x64xf32> to vector<16x64xbf16>
    %c0_49 = arith.constant 0 : index
    %c0_50 = arith.constant 0 : index
    %c0_51 = arith.constant 0 : index
    %96 = vector.load %arg15[%c0_49, %c0_50, %c0_51] : memref<2x64x32xbf16, #tpu.memory_space<vmem>>, vector<1x64x32xbf16>
    %97 = vector.shape_cast %96 : vector<1x64x32xbf16> to vector<64x32xbf16>
    %cst_52 = arith.constant dense<0.000000e+00> : vector<16x32xf32>
    %98 = tpu.matmul %95, %97, %cst_52 {dimension_numbers = #tpu.dot_dimension_numbers<[1], [0], [0], [1], [0, 0, 1, 1], [], []>} : vector<16x64xbf16>, vector<64x32xbf16>, vector<16x32xf32> -> vector<16x32xf32>
    %c0_53 = arith.constant 0 : index
    %c0_54 = arith.constant 0 : index
    %c0_55 = arith.constant 0 : index
    %99 = vector.load %arg16[%c0_53, %c0_54, %c0_55] : memref<2x1x32xf32, #tpu.memory_space<vmem>>, vector<1x1x32xf32>
    %100 = vector.shape_cast %99 : vector<1x1x32xf32> to vector<1x32xf32>
    %101 = vector.broadcast %100 : vector<1x32xf32> to vector<16x32xf32>
    %102 = arith.addf %98, %101 : vector<16x32xf32>
    %103 = arith.addf %102, %84 : vector<16x32xf32>
    %c0_56 = arith.constant 0 : index
    %c0_57 = arith.constant 0 : index
    %c0_58 = arith.constant 0 : index
    %104 = vector.load %arg17[%c0_56, %c0_57, %c0_58] : memref<2x1x32xf32, #tpu.memory_space<vmem>>, vector<1x1x32xf32>
    %105 = vector.shape_cast %104 : vector<1x1x32xf32> to vector<1x32xf32>
    %c0_59 = arith.constant 0 : index
    %c0_60 = arith.constant 0 : index
    %c0_61 = arith.constant 0 : index
    %106 = vector.load %arg18[%c0_59, %c0_60, %c0_61] : memref<2x1x32xf32, #tpu.memory_space<vmem>>, vector<1x1x32xf32>
    %107 = vector.shape_cast %106 : vector<1x1x32xf32> to vector<1x32xf32>
    %cst_62 = arith.constant dense<0.000000e+00> : vector<16xf32>
    %108 = vector.multi_reduction <add>, %103, %cst_62 [1] : vector<16x32xf32> to vector<16xf32>
    %109 = vector.shape_cast %108 : vector<16xf32> to vector<16x1xf32>
    %cst_63 = arith.constant 3.200000e+01 : f32
    %110 = vector.broadcast %cst_63 : f32 to vector<16x1xf32>
    %111 = arith.divf %109, %110 : vector<16x1xf32>
    %112 = vector.broadcast %111 : vector<16x1xf32> to vector<16x32xf32>
    %113 = arith.subf %103, %112 : vector<16x32xf32>
    %114 = arith.mulf %113, %113 : vector<16x32xf32>
    %cst_64 = arith.constant dense<0.000000e+00> : vector<16xf32>
    %115 = vector.multi_reduction <add>, %114, %cst_64 [1] : vector<16x32xf32> to vector<16xf32>
    %116 = vector.shape_cast %115 : vector<16xf32> to vector<16x1xf32>
    %cst_65 = arith.constant 3.200000e+01 : f32
    %117 = vector.broadcast %cst_65 : f32 to vector<16x1xf32>
    %118 = arith.divf %116, %117 : vector<16x1xf32>
    %cst_66 = arith.constant 9.99999974E-6 : f32
    %119 = vector.broadcast %cst_66 : f32 to vector<16x1xf32>
    %120 = arith.addf %118, %119 : vector<16x1xf32>
    %121 = math.rsqrt %120 : vector<16x1xf32>
    %122 = vector.broadcast %121 : vector<16x1xf32> to vector<16x32xf32>
    %123 = arith.mulf %113, %122 : vector<16x32xf32>
    %124 = vector.broadcast %105 : vector<1x32xf32> to vector<16x32xf32>
    %125 = arith.mulf %123, %124 : vector<16x32xf32>
    %126 = vector.broadcast %107 : vector<1x32xf32> to vector<16x32xf32>
    %127 = arith.addf %125, %126 : vector<16x32xf32>
    %128 = arith.mulf %127, %1 : vector<16x32xf32>
    %129 = arith.truncf %128 : vector<16x32xf32> to vector<16x32xbf16>
    %c1 = arith.constant 1 : index
    %c0_67 = arith.constant 0 : index
    %c0_68 = arith.constant 0 : index
    %130 = vector.load %arg7[%c1, %c0_67, %c0_68] : memref<2x32x96xbf16, #tpu.memory_space<vmem>>, vector<1x32x96xbf16>
    %131 = vector.shape_cast %130 : vector<1x32x96xbf16> to vector<32x96xbf16>
    %cst_69 = arith.constant dense<0.000000e+00> : vector<16x96xf32>
    %132 = tpu.matmul %129, %131, %cst_69 {dimension_numbers = #tpu.dot_dimension_numbers<[1], [0], [0], [1], [0, 0, 1, 1], [], []>} : vector<16x32xbf16>, vector<32x96xbf16>, vector<16x96xf32> -> vector<16x96xf32>
    %c1_70 = arith.constant 1 : index
    %c0_71 = arith.constant 0 : index
    %c0_72 = arith.constant 0 : index
    %133 = vector.load %arg8[%c1_70, %c0_71, %c0_72] : memref<2x1x96xf32, #tpu.memory_space<vmem>>, vector<1x1x96xf32>
    %134 = vector.shape_cast %133 : vector<1x1x96xf32> to vector<1x96xf32>
    %135 = vector.broadcast %134 : vector<1x96xf32> to vector<16x96xf32>
    %136 = arith.addf %132, %135 : vector<16x96xf32>
    %137 = vector.shape_cast %136 : vector<16x96xf32> to vector<2x8x96xf32>
    %138 = vector.extract_strided_slice %137 {offsets = [0, 0, 0], sizes = [2, 8, 16], strides = [1, 1, 1]} : vector<2x8x96xf32> to vector<2x8x16xf32>
    %139 = vector.extract_strided_slice %137 {offsets = [0, 0, 16], sizes = [2, 8, 16], strides = [1, 1, 1]} : vector<2x8x96xf32> to vector<2x8x16xf32>
    %140 = tpu.concatenate %138, %139 in 0 : vector<2x8x16xf32>, vector<2x8x16xf32> -> vector<4x8x16xf32>
    %141 = vector.extract_strided_slice %137 {offsets = [0, 0, 32], sizes = [2, 8, 16], strides = [1, 1, 1]} : vector<2x8x96xf32> to vector<2x8x16xf32>
    %142 = vector.extract_strided_slice %137 {offsets = [0, 0, 48], sizes = [2, 8, 16], strides = [1, 1, 1]} : vector<2x8x96xf32> to vector<2x8x16xf32>
    %143 = tpu.concatenate %141, %142 in 0 : vector<2x8x16xf32>, vector<2x8x16xf32> -> vector<4x8x16xf32>
    %144 = vector.extract_strided_slice %137 {offsets = [0, 0, 64], sizes = [2, 8, 16], strides = [1, 1, 1]} : vector<2x8x96xf32> to vector<2x8x16xf32>
    %145 = vector.extract_strided_slice %137 {offsets = [0, 0, 80], sizes = [2, 8, 16], strides = [1, 1, 1]} : vector<2x8x96xf32> to vector<2x8x16xf32>
    %146 = tpu.concatenate %144, %145 in 0 : vector<2x8x16xf32>, vector<2x8x16xf32> -> vector<4x8x16xf32>
    %147 = arith.truncf %140 : vector<4x8x16xf32> to vector<4x8x16xbf16>
    %148 = arith.truncf %143 : vector<4x8x16xf32> to vector<4x8x16xbf16>
    "tpu.trace_start"() <{level = 10 : i32, message = "bqd,bkd->bqk"}> : () -> ()
    %cst_73 = arith.constant dense<0.000000e+00> : vector<4x8x8xf32>
    %149 = tpu.matmul %147, %148, %cst_73 {dimension_numbers = #tpu.dot_dimension_numbers<[2], [2], [1], [1], [0, 0, 0, 1, 1, 1], [0], [0]>} : vector<4x8x16xbf16>, vector<4x8x16xbf16>, vector<4x8x8xf32> -> vector<4x8x8xf32>
    "tpu.trace_stop"() : () -> ()
    %150 = arith.addf %149, %3 : vector<4x8x8xf32>
    %cst_74 = arith.constant dense<0xFF800000> : vector<4x8xf32>
    %151 = vector.multi_reduction <maximumf>, %150, %cst_74 [2] : vector<4x8x8xf32> to vector<4x8xf32>
    %152 = vector.shape_cast %151 : vector<4x8xf32> to vector<4x8x1xf32>
    %153 = vector.broadcast %152 : vector<4x8x1xf32> to vector<4x8x8xf32>
    %154 = arith.subf %150, %153 : vector<4x8x8xf32>
    %155 = math.exp %154 : vector<4x8x8xf32>
    %cst_75 = arith.constant dense<0.000000e+00> : vector<4x8xf32>
    %156 = vector.multi_reduction <add>, %155, %cst_75 [2] : vector<4x8x8xf32> to vector<4x8xf32>
    %157 = vector.shape_cast %156 : vector<4x8xf32> to vector<4x8x1xf32>
    %158 = vector.broadcast %157 : vector<4x8x1xf32> to vector<4x8x8xf32>
    %159 = arith.divf %155, %158 : vector<4x8x8xf32>
    %160 = arith.truncf %159 : vector<4x8x8xf32> to vector<4x8x8xbf16>
    %161 = arith.truncf %146 : vector<4x8x16xf32> to vector<4x8x16xbf16>
    "tpu.trace_start"() <{level = 10 : i32, message = "bqk,bkd->bqd"}> : () -> ()
    %cst_76 = arith.constant dense<0.000000e+00> : vector<4x8x16xf32>
    %162 = tpu.matmul %160, %161, %cst_76 {dimension_numbers = #tpu.dot_dimension_numbers<[2], [1], [1], [2], [0, 0, 0, 1, 1, 2], [0], [0]>} : vector<4x8x8xbf16>, vector<4x8x16xbf16>, vector<4x8x16xf32> -> vector<4x8x16xf32>
    "tpu.trace_stop"() : () -> ()
    %163 = vector.extract_strided_slice %162 {offsets = [0, 0, 0], sizes = [2, 8, 16], strides = [1, 1, 1]} : vector<4x8x16xf32> to vector<2x8x16xf32>
    %164 = vector.shape_cast %163 : vector<2x8x16xf32> to vector<16x16xf32>
    %165 = vector.extract_strided_slice %162 {offsets = [2, 0, 0], sizes = [2, 8, 16], strides = [1, 1, 1]} : vector<4x8x16xf32> to vector<2x8x16xf32>
    %166 = vector.shape_cast %165 : vector<2x8x16xf32> to vector<16x16xf32>
    %167 = tpu.concatenate %164, %166 in 1 : vector<16x16xf32>, vector<16x16xf32> -> vector<16x32xf32>
    %168 = arith.truncf %167 : vector<16x32xf32> to vector<16x32xbf16>
    %c1_77 = arith.constant 1 : index
    %c0_78 = arith.constant 0 : index
    %c0_79 = arith.constant 0 : index
    %169 = vector.load %arg9[%c1_77, %c0_78, %c0_79] : memref<2x32x32xbf16, #tpu.memory_space<vmem>>, vector<1x32x32xbf16>
    %170 = vector.shape_cast %169 : vector<1x32x32xbf16> to vector<32x32xbf16>
    %cst_80 = arith.constant dense<0.000000e+00> : vector<16x32xf32>
    %171 = tpu.matmul %168, %170, %cst_80 {dimension_numbers = #tpu.dot_dimension_numbers<[1], [0], [0], [1], [0, 0, 1, 1], [], []>} : vector<16x32xbf16>, vector<32x32xbf16>, vector<16x32xf32> -> vector<16x32xf32>
    %c1_81 = arith.constant 1 : index
    %c0_82 = arith.constant 0 : index
    %c0_83 = arith.constant 0 : index
    %172 = vector.load %arg10[%c1_81, %c0_82, %c0_83] : memref<2x1x32xf32, #tpu.memory_space<vmem>>, vector<1x1x32xf32>
    %173 = vector.shape_cast %172 : vector<1x1x32xf32> to vector<1x32xf32>
    %174 = vector.broadcast %173 : vector<1x32xf32> to vector<16x32xf32>
    %175 = arith.addf %171, %174 : vector<16x32xf32>
    %176 = arith.addf %175, %128 : vector<16x32xf32>
    %c1_84 = arith.constant 1 : index
    %c0_85 = arith.constant 0 : index
    %c0_86 = arith.constant 0 : index
    %177 = vector.load %arg11[%c1_84, %c0_85, %c0_86] : memref<2x1x32xf32, #tpu.memory_space<vmem>>, vector<1x1x32xf32>
    %178 = vector.shape_cast %177 : vector<1x1x32xf32> to vector<1x32xf32>
    %c1_87 = arith.constant 1 : index
    %c0_88 = arith.constant 0 : index
    %c0_89 = arith.constant 0 : index
    %179 = vector.load %arg12[%c1_87, %c0_88, %c0_89] : memref<2x1x32xf32, #tpu.memory_space<vmem>>, vector<1x1x32xf32>
    %180 = vector.shape_cast %179 : vector<1x1x32xf32> to vector<1x32xf32>
    %cst_90 = arith.constant dense<0.000000e+00> : vector<16xf32>
    %181 = vector.multi_reduction <add>, %176, %cst_90 [1] : vector<16x32xf32> to vector<16xf32>
    %182 = vector.shape_cast %181 : vector<16xf32> to vector<16x1xf32>
    %cst_91 = arith.constant 3.200000e+01 : f32
    %183 = vector.broadcast %cst_91 : f32 to vector<16x1xf32>
    %184 = arith.divf %182, %183 : vector<16x1xf32>
    %185 = vector.broadcast %184 : vector<16x1xf32> to vector<16x32xf32>
    %186 = arith.subf %176, %185 : vector<16x32xf32>
    %187 = arith.mulf %186, %186 : vector<16x32xf32>
    %cst_92 = arith.constant dense<0.000000e+00> : vector<16xf32>
    %188 = vector.multi_reduction <add>, %187, %cst_92 [1] : vector<16x32xf32> to vector<16xf32>
    %189 = vector.shape_cast %188 : vector<16xf32> to vector<16x1xf32>
    %cst_93 = arith.constant 3.200000e+01 : f32
    %190 = vector.broadcast %cst_93 : f32 to vector<16x1xf32>
    %191 = arith.divf %189, %190 : vector<16x1xf32>
    %cst_94 = arith.constant 9.99999974E-6 : f32
    %192 = vector.broadcast %cst_94 : f32 to vector<16x1xf32>
    %193 = arith.addf %191, %192 : vector<16x1xf32>
    %194 = math.rsqrt %193 : vector<16x1xf32>
    %195 = vector.broadcast %194 : vector<16x1xf32> to vector<16x32xf32>
    %196 = arith.mulf %186, %195 : vector<16x32xf32>
    %197 = vector.broadcast %178 : vector<1x32xf32> to vector<16x32xf32>
    %198 = arith.mulf %196, %197 : vector<16x32xf32>
    %199 = vector.broadcast %180 : vector<1x32xf32> to vector<16x32xf32>
    %200 = arith.addf %198, %199 : vector<16x32xf32>
    %201 = arith.mulf %200, %1 : vector<16x32xf32>
    %202 = arith.truncf %201 : vector<16x32xf32> to vector<16x32xbf16>
    %c1_95 = arith.constant 1 : index
    %c0_96 = arith.constant 0 : index
    %c0_97 = arith.constant 0 : index
    %203 = vector.load %arg13[%c1_95, %c0_96, %c0_97] : memref<2x32x64xbf16, #tpu.memory_space<vmem>>, vector<1x32x64xbf16>
    %204 = vector.shape_cast %203 : vector<1x32x64xbf16> to vector<32x64xbf16>
    %cst_98 = arith.constant dense<0.000000e+00> : vector<16x64xf32>
    %205 = tpu.matmul %202, %204, %cst_98 {dimension_numbers = #tpu.dot_dimension_numbers<[1], [0], [0], [1], [0, 0, 1, 1], [], []>} : vector<16x32xbf16>, vector<32x64xbf16>, vector<16x64xf32> -> vector<16x64xf32>
    %c1_99 = arith.constant 1 : index
    %c0_100 = arith.constant 0 : index
    %c0_101 = arith.constant 0 : index
    %206 = vector.load %arg14[%c1_99, %c0_100, %c0_101] : memref<2x1x64xf32, #tpu.memory_space<vmem>>, vector<1x1x64xf32>
    %207 = vector.shape_cast %206 : vector<1x1x64xf32> to vector<1x64xf32>
    %208 = vector.broadcast %207 : vector<1x64xf32> to vector<16x64xf32>
    %209 = arith.addf %205, %208 : vector<16x64xf32>
    %cst_102 = arith.constant 0.000000e+00 : f32
    %210 = vector.broadcast %cst_102 : f32 to vector<16x64xf32>
    %211 = arith.maximumf %209, %210 : vector<16x64xf32>
    %212 = arith.truncf %211 : vector<16x64xf32> to vector<16x64xbf16>
    %c1_103 = arith.constant 1 : index
    %c0_104 = arith.constant 0 : index
    %c0_105 = arith.constant 0 : index
    %213 = vector.load %arg15[%c1_103, %c0_104, %c0_105] : memref<2x64x32xbf16, #tpu.memory_space<vmem>>, vector<1x64x32xbf16>
    %214 = vector.shape_cast %213 : vector<1x64x32xbf16> to vector<64x32xbf16>
    %cst_106 = arith.constant dense<0.000000e+00> : vector<16x32xf32>
    %215 = tpu.matmul %212, %214, %cst_106 {dimension_numbers = #tpu.dot_dimension_numbers<[1], [0], [0], [1], [0, 0, 1, 1], [], []>} : vector<16x64xbf16>, vector<64x32xbf16>, vector<16x32xf32> -> vector<16x32xf32>
    %c1_107 = arith.constant 1 : index
    %c0_108 = arith.constant 0 : index
    %c0_109 = arith.constant 0 : index
    %216 = vector.load %arg16[%c1_107, %c0_108, %c0_109] : memref<2x1x32xf32, #tpu.memory_space<vmem>>, vector<1x1x32xf32>
    %217 = vector.shape_cast %216 : vector<1x1x32xf32> to vector<1x32xf32>
    %218 = vector.broadcast %217 : vector<1x32xf32> to vector<16x32xf32>
    %219 = arith.addf %215, %218 : vector<16x32xf32>
    %220 = arith.addf %219, %201 : vector<16x32xf32>
    %c1_110 = arith.constant 1 : index
    %c0_111 = arith.constant 0 : index
    %c0_112 = arith.constant 0 : index
    %221 = vector.load %arg17[%c1_110, %c0_111, %c0_112] : memref<2x1x32xf32, #tpu.memory_space<vmem>>, vector<1x1x32xf32>
    %222 = vector.shape_cast %221 : vector<1x1x32xf32> to vector<1x32xf32>
    %c1_113 = arith.constant 1 : index
    %c0_114 = arith.constant 0 : index
    %c0_115 = arith.constant 0 : index
    %223 = vector.load %arg18[%c1_113, %c0_114, %c0_115] : memref<2x1x32xf32, #tpu.memory_space<vmem>>, vector<1x1x32xf32>
    %224 = vector.shape_cast %223 : vector<1x1x32xf32> to vector<1x32xf32>
    %cst_116 = arith.constant dense<0.000000e+00> : vector<16xf32>
    %225 = vector.multi_reduction <add>, %220, %cst_116 [1] : vector<16x32xf32> to vector<16xf32>
    %226 = vector.shape_cast %225 : vector<16xf32> to vector<16x1xf32>
    %cst_117 = arith.constant 3.200000e+01 : f32
    %227 = vector.broadcast %cst_117 : f32 to vector<16x1xf32>
    %228 = arith.divf %226, %227 : vector<16x1xf32>
    %229 = vector.broadcast %228 : vector<16x1xf32> to vector<16x32xf32>
    %230 = arith.subf %220, %229 : vector<16x32xf32>
    %231 = arith.mulf %230, %230 : vector<16x32xf32>
    %cst_118 = arith.constant dense<0.000000e+00> : vector<16xf32>
    %232 = vector.multi_reduction <add>, %231, %cst_118 [1] : vector<16x32xf32> to vector<16xf32>
    %233 = vector.shape_cast %232 : vector<16xf32> to vector<16x1xf32>
    %cst_119 = arith.constant 3.200000e+01 : f32
    %234 = vector.broadcast %cst_119 : f32 to vector<16x1xf32>
    %235 = arith.divf %233, %234 : vector<16x1xf32>
    %cst_120 = arith.constant 9.99999974E-6 : f32
    %236 = vector.broadcast %cst_120 : f32 to vector<16x1xf32>
    %237 = arith.addf %235, %236 : vector<16x1xf32>
    %238 = math.rsqrt %237 : vector<16x1xf32>
    %239 = vector.broadcast %238 : vector<16x1xf32> to vector<16x32xf32>
    %240 = arith.mulf %230, %239 : vector<16x32xf32>
    %241 = vector.broadcast %222 : vector<1x32xf32> to vector<16x32xf32>
    %242 = arith.mulf %240, %241 : vector<16x32xf32>
    %243 = vector.broadcast %224 : vector<1x32xf32> to vector<16x32xf32>
    %244 = arith.addf %242, %243 : vector<16x32xf32>
    %245 = arith.mulf %244, %1 : vector<16x32xf32>
    %c0_121 = arith.constant 0 : index
    %c0_122 = arith.constant 0 : index
    %246 = vector.load %arg19[%c0_121, %c0_122] : memref<16x32xf32, #tpu.memory_space<vmem>>, vector<16x32xf32>
    tpu.vector_store %arg19[%c0_121, %c0_122], %245 {strides = array<i32>} : memref<16x32xf32, #tpu.memory_space<vmem>>, vector<16x32xf32>,
    return
  }
  func.func @transform_0(%arg0: i32) -> (i32, i32) {
    %c0_i32 = arith.constant 0 : i32
    %c0_i32_0 = arith.constant 0 : i32
    return %arg0, %c0_i32 : i32, i32
  }
  func.func @transform_1(%arg0: i32) -> (i32, i32) {
    %c0_i32 = arith.constant 0 : i32
    %c0_i32_0 = arith.constant 0 : i32
    return %arg0, %c0_i32 : i32, i32
  }
  func.func @transform_2(%arg0: i32) -> (i32, i32, i32) {
    %c0_i32 = arith.constant 0 : i32
    %c0_i32_0 = arith.constant 0 : i32
    %c0_i32_1 = arith.constant 0 : i32
    return %arg0, %c0_i32, %c0_i32_0 : i32, i32, i32
  }
  func.func @transform_3(%arg0: i32) -> (i32, i32) {
    %c0_i32 = arith.constant 0 : i32
    %c0_i32_0 = arith.constant 0 : i32
    %c0_i32_1 = arith.constant 0 : i32
    return %c0_i32, %c0_i32_0 : i32, i32
  }
  func.func @transform_4(%arg0: i32) -> (i32, i32) {
    %c0_i32 = arith.constant 0 : i32
    %c0_i32_0 = arith.constant 0 : i32
    %c0_i32_1 = arith.constant 0 : i32
    return %c0_i32, %c0_i32_0 : i32, i32
  }
  func.func @transform_5(%arg0: i32) -> (i32, i32) {
    %c0_i32 = arith.constant 0 : i32
    %c0_i32_0 = arith.constant 0 : i32
    %c0_i32_1 = arith.constant 0 : i32
    return %c0_i32, %c0_i32_0 : i32, i32
  }
  func.func @transform_6(%arg0: i32) -> (i32, i32, i32) {
    %c0_i32 = arith.constant 0 : i32
    %c0_i32_0 = arith.constant 0 : i32
    %c0_i32_1 = arith.constant 0 : i32
    %c0_i32_2 = arith.constant 0 : i32
    return %c0_i32, %c0_i32_0, %c0_i32_1 : i32, i32, i32
  }
  func.func @transform_7(%arg0: i32) -> (i32, i32, i32) {
    %c0_i32 = arith.constant 0 : i32
    %c0_i32_0 = arith.constant 0 : i32
    %c0_i32_1 = arith.constant 0 : i32
    %c0_i32_2 = arith.constant 0 : i32
    return %c0_i32, %c0_i32_0, %c0_i32_1 : i32, i32, i32
  }
  func.func @transform_8(%arg0: i32) -> (i32, i32, i32) {
    %c0_i32 = arith.constant 0 : i32
    %c0_i32_0 = arith.constant 0 : i32
    %c0_i32_1 = arith.constant 0 : i32
    %c0_i32_2 = arith.constant 0 : i32
    return %c0_i32, %c0_i32_0, %c0_i32_1 : i32, i32, i32
  }
  func.func @transform_9(%arg0: i32) -> (i32, i32, i32) {
    %c0_i32 = arith.constant 0 : i32
    %c0_i32_0 = arith.constant 0 : i32
    %c0_i32_1 = arith.constant 0 : i32
    %c0_i32_2 = arith.constant 0 : i32
    return %c0_i32, %c0_i32_0, %c0_i32_1 : i32, i32, i32
  }
  func.func @transform_10(%arg0: i32) -> (i32, i32, i32) {
    %c0_i32 = arith.constant 0 : i32
    %c0_i32_0 = arith.constant 0 : i32
    %c0_i32_1 = arith.constant 0 : i32
    %c0_i32_2 = arith.constant 0 : i32
    return %c0_i32, %c0_i32_0, %c0_i32_1 : i32, i32, i32
  }
  func.func @transform_11(%arg0: i32) -> (i32, i32, i32) {
    %c0_i32 = arith.constant 0 : i32
    %c0_i32_0 = arith.constant 0 : i32
    %c0_i32_1 = arith.constant 0 : i32
    %c0_i32_2 = arith.constant 0 : i32
    return %c0_i32, %c0_i32_0, %c0_i32_1 : i32, i32, i32
  }
  func.func @transform_12(%arg0: i32) -> (i32, i32, i32) {
    %c0_i32 = arith.constant 0 : i32
    %c0_i32_0 = arith.constant 0 : i32
    %c0_i32_1 = arith.constant 0 : i32
    %c0_i32_2 = arith.constant 0 : i32
    return %c0_i32, %c0_i32_0, %c0_i32_1 : i32, i32, i32
  }
  func.func @transform_13(%arg0: i32) -> (i32, i32, i32) {
    %c0_i32 = arith.constant 0 : i32
    %c0_i32_0 = arith.constant 0 : i32
    %c0_i32_1 = arith.constant 0 : i32
    %c0_i32_2 = arith.constant 0 : i32
    return %c0_i32, %c0_i32_0, %c0_i32_1 : i32, i32, i32
  }
  func.func @transform_14(%arg0: i32) -> (i32, i32, i32) {
    %c0_i32 = arith.constant 0 : i32
    %c0_i32_0 = arith.constant 0 : i32
    %c0_i32_1 = arith.constant 0 : i32
    %c0_i32_2 = arith.constant 0 : i32
    return %c0_i32, %c0_i32_0, %c0_i32_1 : i32, i32, i32
  }
  func.func @transform_15(%arg0: i32) -> (i32, i32, i32) {
    %c0_i32 = arith.constant 0 : i32
    %c0_i32_0 = arith.constant 0 : i32
    %c0_i32_1 = arith.constant 0 : i32
    %c0_i32_2 = arith.constant 0 : i32
    return %c0_i32, %c0_i32_0, %c0_i32_1 : i32, i32, i32
  }
  func.func @transform_16(%arg0: i32) -> (i32, i32, i32) {
    %c0_i32 = arith.constant 0 : i32
    %c0_i32_0 = arith.constant 0 : i32
    %c0_i32_1 = arith.constant 0 : i32
    %c0_i32_2 = arith.constant 0 : i32
    return %c0_i32, %c0_i32_0, %c0_i32_1 : i32, i32, i32
  }
  func.func @transform_17(%arg0: i32) -> (i32, i32, i32) {
    %c0_i32 = arith.constant 0 : i32
    %c0_i32_0 = arith.constant 0 : i32
    %c0_i32_1 = arith.constant 0 : i32
    %c0_i32_2 = arith.constant 0 : i32
    return %c0_i32, %c0_i32_0, %c0_i32_1 : i32, i32, i32
  }
  func.func @transform_18(%arg0: i32) -> (i32, i32) {
    %c0_i32 = arith.constant 0 : i32
    %c0_i32_0 = arith.constant 0 : i32
    return %arg0, %c0_i32 : i32, i32
  }
}

</mosaic_0001>

<bundles_post_ra>
// kernel: encoder2_forward.1
= control target key start
LH: loop header
LB: loop body
LE: loop exit
PB: predicated region body
PF: predicated region fallthrough
CT: control target
= control target key end

     0   :  { %s3874_s0 = inlined_call_operand.vmem [shape: f32[32,16], index: 0, kind: input, shape index: {}]   ;;  %s3875_s1 = inlined_call_operand.vmem [shape: f32[32,32], index: 1, kind: input, shape index: {}]   ;;  %s3876_s2 = inlined_call_operand.vmem [shape: f32[4,8,8], index: 2, kind: input, shape index: {}]   ;;  %s3877_s3 = inlined_call_operand.vmem [shape: f32[16,32], index: 3, kind: input, shape index: {}]   ;;  %s3878_s4 = inlined_call_operand.vmem [shape: bf16[16,32], index: 4, kind: input, shape index: {}]   ;;  %s3879_s5 = inlined_call_operand.hbm [shape: f32[1,32], index: 5, kind: input, shape index: {}]   ;;  %s3880_s6 = inlined_call_operand.vmem [shape: bf16[2,32,96], index: 6, kind: input, shape index: {}]   ;;  %s3881_s7 = inlined_call_operand.vmem [shape: f32[2,1,96], index: 7, kind: input, shape index: {}]   ;;  %s3882_s8 = inlined_call_operand.vmem [shape: bf16[2,32,32], index: 8, kind: input, shape index: {}]   ;;  %s3883_s9 = inlined_call_operand.vmem [shape: f32[2,1,32], index: 9, kind: input, shape index: {}]   ;;  %s3884_s10 = inlined_call_operand.vmem [shape: f32[2,1,32], index: 10, kind: input, shape index: {}]   ;;  %s3885_s11 = inlined_call_operand.vmem [shape: f32[2,1,32], index: 11, kind: input, shape index: {}]   ;;  %s3886_s12 = inlined_call_operand.vmem [shape: bf16[2,32,64], index: 12, kind: input, shape index: {}]   ;;  %s3887_s13 = inlined_call_operand.hbm [shape: f32[2,1,64], index: 13, kind: input, shape index: {}]   ;;  %s3888_s14 = inlined_call_operand.vmem [shape: bf16[2,64,32], index: 14, kind: input, shape index: {}]   ;;  %s3889_s15 = inlined_call_operand.hbm [shape: f32[2,1,32], index: 15, kind: input, shape index: {}]   ;;  %s3890_s16 = inlined_call_operand.vmem [shape: f32[2,1,32], index: 16, kind: input, shape index: {}]   ;;  %s3891_s17 = inlined_call_operand.vmem [shape: f32[2,1,32], index: 17, kind: input, shape index: {}]   ;;  %s3892_s18 = inlined_call_operand.hbm [shape: f32[32,32], index: 18, kind: output, shape index: {}]  }
   0x1   :  { %3902 = sst [smem:[#allocation18_spill]] %s3874_s0 }
   0x2   :  { %3903 = sst [smem:[#allocation19_spill]] %s3875_s1 }
   0x3   :  { %3904 = sst [smem:[#allocation20_spill]] %s3876_s2 }
   0x4   :  { %3905 = sst [smem:[#allocation21_spill]] %s3892_s18 }
   0x5   :  { %23 = vsyncpa [#allocation3], 0 }
   0x6   :  { %24 = vsyncpa [#allocation6], 0 }
   0x7   :  { %25 = vsyncpa [#allocation4], 0 }
   0x8   :  { %27 = vsyncpa [#allocation4 + $0x1], 0  ;;  %s3347_s27 = smov 0   ;;  %s3349_s28 = smov 0  }
   0x9   :  { %s3351_s29 = smov 0   ;;  %s3353_s30 = smov 0  }
   0xa LB: > { %3906 = sst [smem:[#allocation12_spill]] %s3224_s27  ;;  %s3368_s0 = sadd.s32 4294967295, %s3236_s30   ;;  %s3236_s30 = sphi %s3353_s30, %s3930_s30   ;;  %s3232_s29 = sphi %s3351_s29, %s3932_s29   ;;  %s3228_s28 = sphi %s3349_s28, %s3934_s28   ;;  %s3224_s27 = sphi %s3347_s27, %s3933_s27  }
   0xb   : > { %3907 = sst [smem:[#allocation13_spill]] %s3232_s29  ;;  %s2573_s19 = sadd.s32 4294967294, %s3236_s30  }
   0xc   : > { %3908 = sst [smem:[#allocation14_spill]] %s3236_s30  ;;  %s3372_s1 = sadd.s32 1, %s3236_s30  }
   0xd   : > { %3909 = sst [smem:[#allocation15_spill]] %s3372_s1  ;;  %s433_s20 = sadd.s32 1, %s3232_s29 }
   0xe   : > { %s430_s21 = ssub.s32 %s3236_s30, %s3372_s1  ;;  %p443_p0 = scmp.ne.s32.totalorder %s3232_s29, %s3228_s28 }
   0xf   : > { %p431_p1 = scmp.eq.s32.totalorder %s430_s21, 0  ;;  %p444_p2 = scmp.eq.s32.totalorder %s3368_s0, 1 }
  0x10   : > { %p449_p3 = scmp.ne.s32.totalorder %s3228_s28, %s3224_s27  ;;  %p450_p4 = scmp.eq.s32.totalorder %s2573_s19, 1 }
  0x11   : > { %s3383_s22 = scalar_select %p431_p1, %s3232_s29, %s433_s20  }
  0x12   : > { %p3385_p5 = por %p444_p2, %p443_p0  ;;  %p3389_p6 = por %p450_p4, %p449_p3 }
  0x13   : > { %3910 = sst [smem:[#allocation16_spill]] %s3383_s22  ;;  %p2574_p7 = scmp.ge.s32.totalorder %s3236_s30, 1 }
  0x14   : > { %s3911_s2 = scalar_select %p3385_p5, 1, 0 }
  0x15   : > { %s3912_s23 = scalar_select %p3389_p6, 1, 0 }
  0x16   : > { %p457_p8 = scmp.lt.s32.totalorder %s3236_s30, 3  ;;  %p3899_p9 = scmp.eq.s32.totalorder %s3368_s0, 0 }
  0x17   : > { %3913 = sst [smem:[#allocation17_spill]] %s3912_s23  ;;  %s3238_s25 = smov [#allocation5]  }
  0x18   : > { %p3396_p10 = pnand %p2574_p7, %p457_p8  ;;  %s507_s26 = sshll.u32 %s3238_s25, 4  ;;  %s508_s26 = int_to_ptr.vmem [resolvable:$true] %s507_s26 }
  0x19   : > { %s3239_s20 = smov [#allocation2]   ;;  %s3240_s22 = smov [#allocation7]  }
  0x1a   : > { %p2935_p11 = pneg %p3396_p10  ;;  %s476_s21 = sshll.u32 %s3239_s20, 4  ;;  %s477_s21 = int_to_ptr.vmem [resolvable:$true] %s476_s21 }
  0x1b   : > { %s523_s29 = sshll.u32 %s3240_s22, 4  ;;  %s3101_s1 = scalar_lea.vmem %s508_s26, 32  ;;  %s524_s29 = int_to_ptr.vmem [resolvable:$true] %s523_s29 }
  0x1c   : > { %p3404_p12 = pnand %p3899_p9, %p2935_p11  ;;  %p3102_p0 = scmp.ne.s32.totalorder %s508_s26, %s3101_s1 }
  0x1d   : > { %p3109_p3 = scmp.lt.s32.totalorder %s508_s26, %s508_s26  ;;  %p3110_p4 = scmp.lt.s32.totalorder %s3101_s1, %s3101_s1 }
  0x1e   : > { %p3092_p13 = pneg %p3404_p12 }
  0x1f   : > { %p3111_p7 = por %p3110_p4, %p3109_p3 }
  0x20   : > { %p3104_p1 = pnand %p3102_p0, %p3092_p13 }
  0x22   : > { %p3105_p2 = pneg %p3104_p1 }
  0x24   : > { %p3112_p8 = pnand %p3111_p7, %p3105_p2 }
  0x26   : > { %3115 = shalt.err (!%p3112_p8)
}
  0x27   : > { %s3241_s25 = smov 16   ;;  %s3242_s20 = smov 1  }
  0x28   : > { %2941 = dma.hbm_to_vmem [thread:$0]  (!%p3404_p12), %s3887_s13, 32, %s508_s26, [#allocation6], %s3241_s25, %s3241_s25, %s3242_s20  }
  0x29   : > { %s3127_s27 = scalar_lea.vmem %s477_s21, 16  ;;  %s3134_s30 = scalar_lea.vmem %s477_s21, 32 }
  0x2a   : > { %p3128_p11 = scmp.ne.s32.totalorder %s477_s21, %s3127_s27  ;;  %p3135_p9 = scmp.lt.s32.totalorder %s477_s21, %s477_s21 }
  0x2b   : > { %p3136_p3 = scmp.lt.s32.totalorder %s3134_s30, %s3127_s27 }
  0x2c   : > { %p3130_p0 = pnand %p3128_p11, %p3092_p13 }
  0x2d   : > { %p3137_p2 = por %p3136_p3, %p3135_p9 }
  0x2e   : > { %p3131_p1 = pneg %p3130_p0 }
  0x30   : > { %p3138_p4 = pnand %p3137_p2, %p3131_p1 }
  0x32   : > { %3141 = shalt.err (!%p3138_p4)
}
  0x33   : > { %2938 = dma.hbm_to_vmem [thread:$0]  (!%p3404_p12), %s3879_s5, 16, %s477_s21, [#allocation3]  }
  0x34   : > { %s3153_s23 = scalar_lea.vmem %s524_s29, 32  ;;  %p3161_p0 = scmp.lt.s32.totalorder %s524_s29, %s524_s29 }
  0x35   : > { %p3154_p7 = scmp.ne.s32.totalorder %s524_s29, %s3153_s23  ;;  %p3162_p6 = scmp.lt.s32.totalorder %s3153_s23, %s3153_s23 }
  0x37   : > { %p3156_p8 = pnand %p3154_p7, %p3092_p13  ;;  %p3163_p5 = por %p3162_p6, %p3161_p0 }
  0x39   : > { %p3157_p11 = pneg %p3156_p8 }
  0x3b   : > { %p3164_p9 = pnand %p3163_p5, %p3157_p11 }
  0x3d   : > { %3167 = shalt.err (!%p3164_p9)
}
  0x3e   : > { %2944 = dma.hbm_to_vmem [thread:$0]  (!%p3404_p12), %s3889_s15, 32, %s524_s29, [#allocation6], %s3241_s25, %s3241_s25, %s3242_s20  }
  0x3f   : > { %572 = sbr.rel (%p3396_p10) target bundleno = 5291 (0x14ab), region = 92  ;;  %p3916_p1 = scmp.eq.s32.totalorder (!%p3396_p10), %s3368_s0, 0 }
  0x44   : > { %3211 = dma.done.wait (%p3916_p1), [#allocation3], 16   ;;  %p3917_p13 = pmov %p3916_p1 }
  0x45   : > { %p3918_p3 = pmov %p3916_p1 }
  0x46   : > { %3213 = vsyncadd (%p3917_p13), [#allocation3], 4294967280 }
  0x47   : > { %3215 = dma.done.wait (%p3918_p3), [#allocation6], 64   ;;  %p3919_p5 = pmov %p3916_p1 }
  0x48   : > { %s2584_s18 = sshll.u32 %s3368_s0, 1  ;;  %v3243_v0 = vmov 0.0   ;;  %vm3244_vm0 = vmmov 0   ;;  %s3920_s19 = sld [smem:[#allocation18_spill]]  ;;  %v3021_v1 = vld [vmem:[%s3878_s4] sm:$0xff]   ;;  %vm686_vm1 = vcmask 130048  }
  0x49   : > { %3217 = vsyncadd (%p3919_p5), [#allocation6], 4294967232  ;;  %2747 = vmatprep.subr.bf16.mxu0 %v3243_v0  ;;  %2749 = vmatprep.mubr.msk.bf16.mxu0 %vm3244_vm0, %v3243_v0  ;;  %p645_p6 = scmp.lt.s32.totalorder %s2584_s18, 3  ;;  %v3022_v5 = vld [vmem:[%s3880_s6 + $0x8] sm:$0xff]   ;;  %v3023_v6 = vld [vmem:[%s3880_s6] sm:$0xff]   ;;  %vm759_vm2 = vcmask 261120  }
  0x4a   : > { %2767 = vmatprep.subr.bf16.mxu1 %v3243_v0  ;;  %2769 = vmatprep.mubr.msk.bf16.mxu1 %vm3244_vm0, %v3243_v0  ;;  %v2590_v7 = vld [vmem:[#allocation2] ss:$0 sm:$0xff]  ;;  %v732_v13 = vld [vmem:[%s3877_s3 + $0x8] sm:$0xff]  ;;  %s3245_s25 = smov 112   ;;  %s3246_s20 = smov 96   ;;  %vm1012_vm3 = vcmask 64512  }
  0x4b   : > { %s3936_s18 = smov (!%p645_p6, %s2584_s18), 3  ;;  %2748 = vmatpush3.bf16.msra.mxu0 %v3021_v1  ;;  %v731_v11 = vld [vmem:[%s3877_s3] sm:$0xff]  ;;  %s3921_s23 = sld [smem:[#allocation20_spill]]  ;;  %vm1066_vm4 = vcmask 1043456   ;;  %vm1491_vm5 = vcmask 523264  }
  0x4c   : > { %s3451_s29 = sshll.u32 %s3936_s18, 3  ;;  %2753 = vmatprep.subr.bf16.mxu0 %v3243_v0  ;;  %v2593_v20 = vld [vmem:[%s3881_s7] ss:$0 sm:$0xff]  ;;  %s3247_s30 = smov 64  }
  0x4d   : > { %s3922_s26 = sld [smem:[#allocation19_spill]]  ;;  %s641_s18 = sand.u32 1, %s3228_s28  }
  0x4e   : > { %s648_s21 = scalar_lea.vmem %s3920_s19, %s3451_s29  ;;  %p3925_p12 = scmp.ne.s32.totalorder %s3911_s2, 0 }
  0x4f   : > { %v664_v2 = vld [vmem:[%s648_s21] sm:$0xff]  ;;  %v665_v3 = vld [vmem:[%s648_s21 + $0x8] sm:$0xff]  ;;  %s3248_s21 = smov 16   ;;  %s3249_s24 = smov [#allocation8]  }
  0x50   : > { %v670_v4 = vpack.c.bf16 %v665_v3, %v664_v2 }
  0x51   : > { %s660_s27 = scalar_lea.vmem %s3921_s23, %s3451_s29 }
  0x52   : > { %2750 = vmatmul.mubr.msk.bf16.vlgmr.msra.gmra.mxu0 %vm686_vm1, %v670_v4  ;;  %v3535_v42 = vld [vmem:[%s660_s27 + $0x8] sm:$0xff]  ;;  %v3538_v46 = vld [vmem:[%s660_s27] sm:$0xff] }
  0x53   : > { %2757 = vmatprep.mubr.msk.bf16.mxu0 %vm3244_vm0, %v3243_v0  ;;  %2754 = vmatpush3.bf16.msra.mxu0 %v3022_v5  ;;  %s654_s19 = scalar_lea.vmem %s3922_s26, %s3451_s29  ;;  %s3923_s29 = sld [smem:[#allocation21_spill]] }
  0x54   : > { %2755 = vmatprep.subr.bf16.mxu0 %v3243_v0 }
  0x57   : > { %2756 = vmatpush3.bf16.msra.mxu0 %v3023_v6 }
  0x58   : > { %2761 = vmatprep.subr.bf16.mxu0 %v3243_v0 }
  0x59   : > { %s3924_s1 = smov %s3923_s29 }
 0x112   : > { %v724_v8 = vpop.f32.mrf.mxu0 }
 0x113   : > { %v725_v10 = vadd.f32 %v2590_v7, %v724_v8 }
 0x114   : > { %v2751_v9 = vpop.f32.mrf.mxu0 }
 0x115   : > { %v3478_v16 = vadd.f32 %v731_v11, %v725_v10 }
 0x116   : > { %v727_v12 = vpop.f32.mrf.mxu0 }
 0x117   : > { %v728_v14 = vadd.f32 %v2590_v7, %v727_v12 }
 0x118   : > { %v2752_v15 = vpop.f32.mrf.mxu0 }
 0x119   : > { %v3480_v17 = vadd.f32 %v732_v13, %v728_v14 }
 0x11b   : > { %v735_v18 = vpack.c.bf16 %v3480_v17, %v3478_v16 }
 0x11d   : > { %2758 = vmatmul.mubr.msk.bf16.vlgmr.msra.gmra.mxu0 %vm759_vm2, %v735_v18 }
 0x11e   : > { %2763 = vmatprep.mubr.msk.bf16.mxu0 %vm3244_vm0, %v3243_v0 }
 0x1dd   : > { %v797_v19 = vpop.f32.mrf.mxu0 }
 0x1de   : > { %v798_v23 = vadd.f32 %v2593_v20, %v797_v19 }
 0x1df   : > { %v2759_v21 = vpop.f32.mrf.mxu0 }
 0x1e0   : > { %v3495_v28 = vpack.c.bf16 %v798_v23, %v798_v23 }
 0x1e1   : > { %v800_v22 = vpop.f32.mrf.mxu0 }
 0x1e2   : > { %v801_v24 = vadd.f32 %v2593_v20, %v800_v22 }
 0x1e3   : > { %v2760_v25 = vpop.f32.mrf.mxu0 }
 0x1e4   : > { %v3490_v26 = vpack.c.bf16 %v801_v24, %v801_v24  ;;  %v3001_v27 = vpack.i.bf16 %v801_v24, %v798_v23 }
 0x1e6   : > { %3002 = vrot.lane.b32.xlu0 %v3001_v27, %s3245_s25  ;;  %866 = vrot.lane.b32.xlu1 %v3490_v26, %s3246_s20 }
 0x1ea   : > { %817 = vrot.lane.b32.xlu0 %v3495_v28, %s3246_s20 }
 0x258   : > { %v3003_v29 = vpop.permute.xlu0 %3002  ;;  %v867_v30 = vpop.permute.xlu1 %866 }
 0x259   : > { %v3005_v31 = vunpack.i.h.bf16 %v3003_v29  ;;  %v3004_v32 = vunpack.i.l.bf16 %v3003_v29  ;;  %v872_v33 = vsel %vm686_vm1, %v867_v30, 0 }
 0x25a   : > { %2768 = vmatpush3.bf16.xpose.msra.mxu1 %v872_v33 }
 0x25b   : > { %v3500_v34 = vpack.c.bf16 %v3005_v31, %v3005_v31  ;;  %v3502_v35 = vpack.c.bf16 %v3004_v32, %v3004_v32  ;;  %2779 = vmatprep.subr.bf16.mxu1 %v3243_v0 }
 0x25c   : > { %v818_v36 = vpop.permute.xlu0 %817 }
 0x25d   : > { %v823_v37 = vsel %vm686_vm1, %v818_v36, 0  ;;  %964 = vrot.lane.b32.xlu0 %v3500_v34, %s3246_s20  ;;  %915 = vrot.lane.b32.xlu1 %v3502_v35, %s3246_s20 }
 0x25e   : > { %2762 = vmatpush3.bf16.xpose.msra.mxu0 %v823_v37 }
 0x25f   : > { %2773 = vmatprep.subr.bf16.mxu0 %v3243_v0 }
 0x261   : > { %2770 = vmatmul.mubr.msk.bf16.vlgmr.msra.gmra.mxu1 %vm686_vm1, %v3490_v26 }
 0x262   : > { %2781 = vmatprep.mubr.msk.bf16.mxu1 %vm3244_vm0, %v3243_v0 }
 0x265   : > { %2764 = vmatmul.mubr.msk.bf16.vlgmr.msra.gmra.mxu0 %vm686_vm1, %v3495_v28 }
 0x266   : > { %2775 = vmatprep.mubr.msk.bf16.mxu0 %vm3244_vm0, %v3243_v0 }
 0x2cf   : > { %v965_v38 = vpop.permute.xlu0 %964  ;;  %v916_v39 = vpop.permute.xlu1 %915 }
 0x2d0   : > { %v970_v40 = vsel %vm686_vm1, %v965_v38, 0  ;;  %v921_v41 = vsel %vm686_vm1, %v916_v39, 0 }
 0x2d1   : > { %2774 = vmatpush3.bf16.xpose.msra.mxu0 %v921_v41  ;;  %2780 = vmatpush3.bf16.xpose.msra.mxu1 %v970_v40 }
 0x2d2   : > { %2785 = vmatprep.subr.bf16.mxu0 %v3243_v0  ;;  %2791 = vmatprep.subr.bf16.mxu1 %v3243_v0 }
 0x2d8   : > { %2776 = vmatmul.mubr.msk.bf16.vlgmr.msra.gmra.mxu0 %vm686_vm1, %v3502_v35  ;;  %2782 = vmatmul.mubr.msk.bf16.vlgmr.msra.gmra.mxu1 %vm686_vm1, %v3500_v34 }
 0x2d9   : > { %2787 = vmatprep.mubr.msk.bf16.mxu0 %vm3244_vm0, %v3243_v0  ;;  %2793 = vmatprep.mubr.msk.bf16.mxu1 %vm3244_vm0, %v3243_v0 }
 0x321   : > { %v908_v43 = vpop.f32.mrf.mxu1 }
 0x322   : > { %v909_v44 = vadd.f32 %v908_v43, %v3535_v42 }
 0x323   : > { %v2771_v45 = vpop.f32.mrf.mxu1 }
 0x324   : > { %v1016_v47 = vsel %vm1012_vm3, %v909_v44, -inf }
 0x325   : > { %1017 = vmax.xlane.f32.xlu0 %v1016_v47  ;;  %v859_v48 = vpop.f32.mrf.mxu0  ;;  %v911_v49 = vpop.f32.mrf.mxu1 }
 0x326   : > { %v860_v50 = vadd.f32 %v859_v48, %v3538_v46 }
 0x327   : > { %v2765_v51 = vpop.f32.mrf.mxu0  ;;  %v2772_v52 = vpop.f32.mrf.mxu1 }
 0x328   : > { %v1013_v53 = vsel %vm1012_vm3, %v860_v50, -inf }
 0x329   : > { %1014 = vmax.xlane.f32.xlu1 %v1013_v53  ;;  %v862_v54 = vpop.f32.mrf.mxu0  ;;  %v3024_v53 = vld [vmem:[%s3882_s8 + $0x8] sm:$0xff]  }
 0x32b   : > { %v2766_v55 = vpop.f32.mrf.mxu0 }
 0x398   : > { %v957_v56 = vpop.f32.mrf.mxu0  ;;  %v1006_v57 = vpop.f32.mrf.mxu1 }
 0x399   : > { %v958_v58 = vadd.f32 %v957_v56, %v3538_v46  ;;  %v1007_v59 = vadd.f32 %v1006_v57, %v3535_v42 }
 0x39a   : > { %v2777_v60 = vpop.f32.mrf.mxu0  ;;  %v2783_v61 = vpop.f32.mrf.mxu1 }
 0x39b   : > { %v1022_v62 = vsel %vm1012_vm3, %v1007_v59, -inf  ;;  %v1019_v63 = vsel %vm1012_vm3, %v958_v58, -inf }
 0x39c   : > { %v1009_v1 = vpop.f32.mrf.mxu1  ;;  %1023 = vmax.xlane.f32.xlu1 %v1022_v62  ;;  %1020 = vmax.xlane.f32.xlu0 %v1019_v63  ;;  %v960_v2 = vpop.f32.mrf.mxu0  ;;  %v3025_v62 = vld [vmem:[%s3882_s8] sm:$0xff]  }
 0x39e   : > { %v2778_v3 = vpop.f32.mrf.mxu0  ;;  %v2784_v4 = vpop.f32.mrf.mxu1 }
 0x3ad   : > { %1110 = vrot.lane.b32.xlu1 %v3490_v26, %s3247_s30 }
 0x3ae   : > { %v1018_v5 = vpop.xlane.xlu0 %1017 }
 0x3af   : > { %v1026_v7 = vsub.f32 %v909_v44, %v1018_v5 }
 0x3b1   : > { %v1031_v9 = vmul.f32 1.442695, %v1026_v7 }
 0x3b2   : > { %1061 = vrot.lane.b32.xlu0 %v3495_v28, %s3247_s30  ;;  %v1015_v6 = vpop.xlane.xlu1 %1014 }
 0x3b3   : > { %v1025_v8 = vsub.f32 %v860_v50, %v1015_v6  ;;  %3042 = vpow2.f32 %v1031_v9 }
 0x3b5   : > { %v1029_v10 = vmul.f32 1.442695, %v1025_v8 }
 0x3b7   : > { %3044 = vpow2.f32 %v1029_v10 }
 0x3c0   : > { %v3043_v11 = vpop.eup %3042 }
 0x3c1   : > { %v1040_v13 = vsel %vm1012_vm3, %v3043_v11, 0.0 }
 0x3c4   : > { %v3045_v12 = vpop.eup %3044 }
 0x3c5   : > { %v1037_v14 = vsel %vm1012_vm3, %v3045_v12, 0.0 }
 0x3d1   : > { %1041 = vadd.xlane.f32.xlu1 %v1040_v13  ;;  %1038 = vadd.xlane.f32.xlu0 %v1037_v14 }
 0x425   : > { %v1024_v15 = vpop.xlane.xlu1 %1023  ;;  %v1021_v18 = vpop.xlane.xlu0 %1020 }
 0x426   : > { %v1028_v19 = vsub.f32 %v1007_v59, %v1024_v15  ;;  %v1027_v20 = vsub.f32 %v958_v58, %v1021_v18  ;;  %v2605_v15 = vld [vmem:[%s3883_s9] ss:$0 sm:$0xff] }
 0x428   : > { %v1035_v21 = vmul.f32 1.442695, %v1028_v19  ;;  %v1033_v22 = vmul.f32 1.442695, %v1027_v20 }
 0x429   : > { %v1111_v23 = vpop.permute.xlu1 %1110  ;;  %v1062_v24 = vpop.permute.xlu0 %1061 }
 0x42a   : > { %3046 = vpow2.f32 %v1035_v21  ;;  %v1116_v25 = vsel %vm1066_vm4, %v1111_v23, 0  ;;  %v1068_v26 = vsel %vm1066_vm4, %v1062_v24, 0 }
 0x42b   : > { %3048 = vpow2.f32 %v1033_v22  ;;  %2786 = vmatpush3.bf16.msra.mxu0 %v1068_v26  ;;  %2792 = vmatpush3.bf16.msra.mxu1 %v1116_v25 }
 0x42c   : > { %2797 = vmatprep.subr.bf16.mxu0 %v3243_v0  ;;  %2803 = vmatprep.subr.bf16.mxu1 %v3243_v0 }
 0x437   : > { %v3047_v27 = vpop.eup %3046 }
 0x438   : > { %v3049_v28 = vpop.eup %3048  ;;  %v1046_v29 = vsel %vm1012_vm3, %v3047_v27, 0.0 }
 0x439   : > { %1047 = vadd.xlane.f32.xlu1 %v1046_v29  ;;  %v1043_v30 = vsel %vm1012_vm3, %v3049_v28, 0.0 }
 0x43a   : > { %1044 = vadd.xlane.f32.xlu0 %v1043_v30 }
 0x44a   : > { %1158 = vrot.lane.b32.xlu1 %v3502_v35, %s3247_s30 }
 0x450   : > { %1206 = vrot.lane.b32.xlu0 %v3500_v34, %s3247_s30 }
 0x45a   : > { %v1042_v31 = vpop.xlane.xlu1 %1041  ;;  %v1039_v32 = vpop.xlane.xlu0 %1038 }
 0x45b   : > { %3050 = vrcp.f32 %v1042_v31 }
 0x45c   : > { %3052 = vrcp.f32 %v1039_v32 }
 0x468   : > { %v3051_v33 = vpop.eup %3050 }
 0x469   : > { %v3053_v36 = vpop.eup %3052  ;;  %v1052_v37 = vmul.f32 %v3051_v33, %v3043_v11 }
 0x46a   : > { %v1050_v38 = vmul.f32 %v3053_v36, %v3045_v12 }
 0x46b   : > { %v1058_v39 = vpack.c.bf16 %v1052_v37, %v1052_v37 }
 0x46c   : > { %v1057_v40 = vpack.c.bf16 %v1050_v38, %v1050_v38 }
 0x46d   : > { %2794 = vmatmul.mubr.msk.bf16.vlgmr.msra.gmra.mxu1 %vm1012_vm3, %v1058_v39  ;;  %v3027_v39 = vld [vmem:[%s3886_s12] sm:$0xff]  }
 0x46e   : > { %2788 = vmatmul.mubr.msk.bf16.vlgmr.msra.gmra.mxu0 %vm1012_vm3, %v1057_v40  ;;  %2805 = vmatprep.mubr.msk.bf16.mxu1 %vm3244_vm0, %v3243_v0  ;;  %v3028_v40 = vld [vmem:[%s3888_s14 + $0x18] sm:$0xff]  }
 0x46f   : > { %2799 = vmatprep.mubr.msk.bf16.mxu0 %vm3244_vm0, %v3243_v0 }
 0x4c2   : > { %v1048_v34 = vpop.xlane.xlu1 %1047 }
 0x4c3   : > { %3054 = vrcp.f32 %v1048_v34  ;;  %v1045_v35 = vpop.xlane.xlu0 %1044 }
 0x4c4   : > { %3056 = vrcp.f32 %v1045_v35 }
 0x4c6   : > { %v1159_v41 = vpop.permute.xlu1 %1158 }
 0x4c7   : > { %v1164_v43 = vsel %vm1066_vm4, %v1159_v41, 0  ;;  %v1207_v44 = vpop.permute.xlu0 %1206 }
 0x4c8   : > { %v1212_v45 = vsel %vm1066_vm4, %v1207_v44, 0  ;;  %2798 = vmatpush3.bf16.msra.mxu0 %v1164_v43 }
 0x4c9   : > { %2804 = vmatpush3.bf16.msra.mxu1 %v1212_v45  ;;  %2809 = vmatprep.subr.bf16.mxu0 %v3243_v0 }
 0x4ca   : > { %2817 = vmatprep.subr.bf16.mxu1 %v3243_v0 }
 0x4d0   : > { %v3055_v47 = vpop.eup %3054 }
 0x4d1   : > { %v3057_v48 = vpop.eup %3056  ;;  %v1056_v49 = vmul.f32 %v3055_v47, %v3047_v27 }
 0x4d2   : > { %v1054_v50 = vmul.f32 %v3057_v48, %v3049_v28  ;;  %v2609_v48 = vld [vmem:[%s3884_s10] ss:$0 sm:$0xff] }
 0x4d3   : > { %v1060_v51 = vpack.c.bf16 %v1056_v49, %v1056_v49 }
 0x4d4   : > { %v1059_v52 = vpack.c.bf16 %v1054_v50, %v1054_v50 }
 0x4d5   : > { %2806 = vmatmul.mubr.msk.bf16.vlgmr.msra.gmra.mxu1 %vm1012_vm3, %v1060_v51 }
 0x4d6   : > { %2800 = vmatmul.mubr.msk.bf16.vlgmr.msra.gmra.mxu0 %vm1012_vm3, %v1059_v52  ;;  %2821 = vmatprep.mubr.msk.bf16.mxu1 %vm3244_vm0, %v3243_v0  ;;  %v2610_v52 = vld [vmem:[%s3885_s11] ss:$0 sm:$0xff] }
 0x4d7   : > { %2813 = vmatprep.mubr.msk.bf16.mxu0 %vm3244_vm0, %v3243_v0  ;;  %2810 = vmatpush3.bf16.msra.mxu0 %v3024_v53 }
 0x4d8   : > { %2811 = vmatprep.subr.bf16.mxu0 %v3243_v0 }
 0x4db   : > { %2812 = vmatpush3.bf16.msra.mxu0 %v3025_v62  ;;  %v3029_v62 = vld [vmem:[%s3888_s14 + $0x10] sm:$0xff]  }
 0x4dc   : > { %2825 = vmatprep.subr.bf16.mxu0 %v3243_v0 }
 0x52d   : > { %v1152_v54 = vpop.f32.mrf.mxu1 }
 0x52e   : > { %v1104_v55 = vpop.f32.mrf.mxu0 }
 0x52f   : > { %v2795_v56 = vpop.f32.mrf.mxu1 }
 0x530   : > { %v2789_v57 = vpop.f32.mrf.mxu0  ;;  %v3624_v56 = vld [vmem:[%s654_s19] sm:$0xff] }
 0x531   : > { %v1155_v58 = vpop.f32.mrf.mxu1  ;;  %v3626_v57 = vld [vmem:[%s654_s19 + $0x8] sm:$0xff] }
 0x532   : > { %v1107_v59 = vpop.f32.mrf.mxu0 }
 0x533   : > { %v2796_v60 = vpop.f32.mrf.mxu1 }
 0x534   : > { %v2790_v61 = vpop.f32.mrf.mxu0 }
 0x595   : > { %v1248_v63 = vpop.f32.mrf.mxu1 }
 0x596   : > { %v1200_v1 = vpop.f32.mrf.mxu0 }
 0x597   : > { %v3006_v2 = vpack.i.bf16 %v1248_v63, %v1200_v1  ;;  %v2807_v3 = vpop.f32.mrf.mxu1  ;;  %v3030_v63 = vld [vmem:[%s3888_s14 + $0x8] sm:$0xff]   ;;  %v3031_v1 = vld [vmem:[%s3888_s14] sm:$0xff]  }
 0x598   : > { %v2801_v4 = vpop.f32.mrf.mxu0 }
 0x599   : > { %3007 = vrot.lane.b32.xlu1 %v3006_v2, %s3248_s21  ;;  %v1251_v5 = vpop.f32.mrf.mxu1  ;;  %v2611_v2 = vld [vmem:[#allocation5] ss:$0 sm:$0xff] }
 0x59a   : > { %v1203_v6 = vpop.f32.mrf.mxu0 }
 0x59b   : > { %v2808_v7 = vpop.f32.mrf.mxu1 }
 0x59c   : > { %v2802_v8 = vpop.f32.mrf.mxu0 }
 0x60b   : > { %v3008_v9 = vpop.permute.xlu1 %3007 }
 0x60c   : > { %v3010_v10 = vunpack.i.h.bf16 %v3008_v9  ;;  %v3009_v11 = vunpack.i.l.bf16 %v3008_v9 }
 0x60e   : > { %v1263_v12 = vsel %vm686_vm1, %v1152_v54, %v3010_v10  ;;  %v1262_v13 = vsel %vm686_vm1, %v1104_v55, %v3009_v11 }
 0x60f   : > { %v1264_v14 = vpack.c.bf16 %v1263_v12, %v1262_v13  ;;  %v2615_v12 = vld [vmem:[#allocation7] ss:$0 sm:$0xff] }
 0x611   : > { %2814 = vmatmul.mubr.msk.bf16.vlgmr.msra.gmra.mxu0 %vm759_vm2, %v1264_v14 }
 0x612   : > { %2833 = vmatprep.mubr.msk.bf16.mxu0 %vm3244_vm0, %v3243_v0  ;;  %2826 = vmatpush3.bf16.msra.mxu0 %v3028_v40 }
 0x613   : > { %2827 = vmatprep.subr.bf16.mxu0 %v3243_v0 }
 0x616   : > { %2828 = vmatpush3.bf16.msra.mxu0 %v3029_v62 }
 0x617   : > { %2829 = vmatprep.subr.bf16.mxu0 %v3243_v0 }
 0x61a   : > { %2830 = vmatpush3.bf16.msra.mxu0 %v3030_v63 }
 0x61b   : > { %2831 = vmatprep.subr.bf16.mxu0 %v3243_v0 }
 0x61e   : > { %2832 = vmatpush3.bf16.msra.mxu0 %v3031_v1 }
 0x61f   : > { %2851 = vmatprep.subr.bf16.mxu0 %v3243_v0 }
 0x6d1   : > { %v1325_v18 = vpop.f32.mrf.mxu0 }
 0x6d2   : > { %v1326_v19 = vadd.f32 %v2605_v15, %v1325_v18 }
 0x6d3   : > { %v2815_v20 = vpop.f32.mrf.mxu0 }
 0x6d4   : > { %v1332_v21 = vadd.f32 %v1326_v19, %v3478_v16 }
 0x6d5   : > { %v1328_v22 = vpop.f32.mrf.mxu0 }
 0x6d6   : > { %v1329_v23 = vadd.f32 %v2605_v15, %v1328_v22  ;;  %v1336_v24 = vsel %vm759_vm2, %v1332_v21, 0.0 }
 0x6d7   : > { %1337 = vadd.xlane.f32.xlu0 %v1336_v24  ;;  %v2816_v25 = vpop.f32.mrf.mxu0 }
 0x6d8   : > { %v1333_v26 = vadd.f32 %v1329_v23, %v3480_v17  ;;  %v3026_v17 = vld [vmem:[%s3886_s12 + $0x8] sm:$0xff]  }
 0x6d9   : > { %2818 = vmatpush3.bf16.msra.mxu1 %v3026_v17 }
 0x6da   : > { %v1339_v27 = vsel %vm759_vm2, %v1333_v26, 0.0  ;;  %2819 = vmatprep.subr.bf16.mxu1 %v3243_v0 }
 0x6db   : > { %1340 = vadd.xlane.f32.xlu1 %v1339_v27 }
 0x6dd   : > { %2820 = vmatpush3.bf16.msra.mxu1 %v3027_v39 }
 0x6de   : > { %2837 = vmatprep.subr.bf16.mxu1 %v3243_v0 }
 0x760   : > { %v1338_v28 = vpop.xlane.xlu0 %1337 }
 0x761   : > { %v1343_v29 = vmul.f32 0.03125, %v1338_v28 }
 0x763   : > { %v1345_v30 = vsub.f32 %v1332_v21, %v1343_v29 }
 0x764   : > { %v1341_v31 = vpop.xlane.xlu1 %1340 }
 0x765   : > { %v1344_v32 = vmul.f32 0.03125, %v1341_v31  ;;  %v1347_v33 = vmul.f32 %v1345_v30, %v1345_v30 }
 0x767   : > { %v1346_v36 = vsub.f32 %v1333_v26, %v1344_v32  ;;  %v1349_v16 = vsel %vm759_vm2, %v1347_v33, 0.0 }
 0x768   : > { %1350 = vadd.xlane.f32.xlu0 %v1349_v16  ;;  %v3032_v16 = vld [vmem:[%s3880_s6 + $0x18] sm:$0xff]  }
 0x769   : > { %v1348_v37 = vmul.f32 %v1346_v36, %v1346_v36 }
 0x76b   : > { %v1352_v38 = vsel %vm759_vm2, %v1348_v37, 0.0  ;;  %v3033_v37 = vld [vmem:[%s3880_s6 + $0x10] sm:$0xff]  }
 0x76c   : > { %1353 = vadd.xlane.f32.xlu0 %v1352_v38 }
 0x7f1   : > { %v1351_v34 = vpop.xlane.xlu0 %1350 }
 0x7f2   : > { %v1355_v35 = vmul.f32 0.03125, %v1351_v34 }
 0x7f4   : > { %v1357_v41 = vadd.f32 1e-05, %v1355_v35 }
 0x7f5   : > { %v1354_v43 = vpop.xlane.xlu0 %1353 }
 0x7f6   : > { %3058 = vrsqrt.f32 %v1357_v41  ;;  %v1356_v44 = vmul.f32 0.03125, %v1354_v43  ;;  %v2621_v43 = vld [vmem:[%s3890_s16] ss:$0 sm:$0xff] }
 0x7f8   : > { %v1358_v45 = vadd.f32 1e-05, %v1356_v44 }
 0x7fa   : > { %3060 = vrsqrt.f32 %v1358_v45 }
 0x803   : > { %v3059_v47 = vpop.eup %3058 }
 0x804   : > { %v1361_v49 = vmul.f32 %v3059_v47, %v1345_v30 }
 0x806   : > { %v1369_v50 = vmul.f32 %v2609_v48, %v1361_v49 }
 0x807   : > { %v3061_v51 = vpop.eup %3060 }
 0x808   : > { %v1362_v53 = vmul.f32 %v3061_v51, %v1346_v36  ;;  %v1377_v55 = vadd.f32 %v2610_v52, %v1369_v50 }
 0x80a   : > { %v1370_v54 = vmul.f32 %v2609_v48, %v1362_v53  ;;  %v1379_v59 = vmul.f32 %v1377_v55, %v3624_v56  ;;  %v2622_v48 = vld [vmem:[%s3891_s17] ss:$0 sm:$0xff] }
 0x80c   : > { %v1378_v58 = vadd.f32 %v2610_v52, %v1370_v54 }
 0x80e   : > { %v1380_v60 = vmul.f32 %v1378_v58, %v3626_v57  ;;  %v2628_v58 = vld [vmem:[%s3881_s7 + $0x1] ss:$0 sm:$0xff] }
 0x810   : > { %v1381_v61 = vpack.c.bf16 %v1380_v60, %v1379_v59 }
 0x812   : > { %2822 = vmatmul.mubr.msk.bf16.vlgmr.msra.gmra.mxu1 %vm759_vm2, %v1381_v61 }
 0x813   : > { %2841 = vmatprep.mubr.msk.bf16.mxu1 %vm3244_vm0, %v3243_v0  ;;  %2838 = vmatpush3.bf16.msra.mxu1 %v3032_v16 }
 0x814   : > { %2839 = vmatprep.subr.bf16.mxu1 %v3243_v0 }
 0x817   : > { %2840 = vmatpush3.bf16.msra.mxu1 %v3033_v37 }
 0x818   : > { %2845 = vmatprep.subr.bf16.mxu1 %v3243_v0 }
 0x8d2   : > { %v1442_v3 = vpop.f32.mrf.mxu1 }
 0x8d3   : > { %v1443_v5 = vadd.f32 %v2611_v2, %v1442_v3 }
 0x8d4   : > { %v2823_v4 = vpop.f32.mrf.mxu1 }
 0x8d5   : > { %v1449_v9 = vmax.f32 %v1443_v5, 0.0 }
 0x8d6   : > { %v1445_v6 = vpop.f32.mrf.mxu1 }
 0x8d7   : > { %v1446_v7 = vadd.f32 %v2611_v2, %v1445_v6 }
 0x8d8   : > { %v2824_v8 = vpop.f32.mrf.mxu1 }
 0x8d9   : > { %v1450_v10 = vmax.f32 %v1446_v7, 0.0 }
 0x8db   : > { %v1451_v11 = vpack.c.bf16 %v1450_v10, %v1449_v9 }
 0x8dd   : > { %2834 = vmatmul.mubr.msk.bf16.vlgmr.msra.gmra.mxu0 %vm1491_vm5, %v1451_v11 }
 0x8de   : > { %2853 = vmatprep.mubr.msk.bf16.mxu0 %vm3244_vm0, %v3243_v0 }
 0x99d   : > { %v1529_v13 = vpop.f32.mrf.mxu0 }
 0x99e   : > { %v1530_v14 = vadd.f32 %v2615_v12, %v1529_v13 }
 0x99f   : > { %v2835_v15 = vpop.f32.mrf.mxu0 }
 0x9a0   : > { %v1536_v18 = vadd.f32 %v1530_v14, %v1379_v59 }
 0x9a1   : > { %v1532_v19 = vpop.f32.mrf.mxu0 }
 0x9a2   : > { %v1533_v20 = vadd.f32 %v2615_v12, %v1532_v19  ;;  %v1540_v21 = vsel %vm759_vm2, %v1536_v18, 0.0 }
 0x9a3   : > { %1541 = vadd.xlane.f32.xlu1 %v1540_v21  ;;  %v2836_v22 = vpop.f32.mrf.mxu0 }
 0x9a4   : > { %v1537_v23 = vadd.f32 %v1533_v20, %v1380_v60 }
 0x9a6   : > { %v1543_v24 = vsel %vm759_vm2, %v1537_v23, 0.0 }
 0x9a7   : > { %1544 = vadd.xlane.f32.xlu0 %v1543_v24 }
 0xa2c   : > { %v1542_v25 = vpop.xlane.xlu1 %1541 }
 0xa2d   : > { %v1546_v26 = vmul.f32 0.03125, %v1542_v25 }
 0xa2f   : > { %v1548_v27 = vsub.f32 %v1536_v18, %v1546_v26 }
 0xa30   : > { %v1545_v28 = vpop.xlane.xlu0 %1544 }
 0xa31   : > { %v1547_v29 = vmul.f32 0.03125, %v1545_v28  ;;  %v1550_v30 = vmul.f32 %v1548_v27, %v1548_v27 }
 0xa33   : > { %v1549_v31 = vsub.f32 %v1537_v23, %v1547_v29  ;;  %v1552_v32 = vsel %vm759_vm2, %v1550_v30, 0.0 }
 0xa34   : > { %1553 = vadd.xlane.f32.xlu1 %v1552_v32 }
 0xa35   : > { %v1551_v33 = vmul.f32 %v1549_v31, %v1549_v31 }
 0xa37   : > { %v1555_v36 = vsel %vm759_vm2, %v1551_v33, 0.0 }
 0xa38   : > { %1556 = vadd.xlane.f32.xlu0 %v1555_v36 }
 0xabd   : > { %v1554_v38 = vpop.xlane.xlu1 %1553 }
 0xabe   : > { %v1558_v17 = vmul.f32 0.03125, %v1554_v38 }
 0xac0   : > { %v1560_v39 = vadd.f32 1e-05, %v1558_v17 }
 0xac1   : > { %v1557_v40 = vpop.xlane.xlu0 %1556 }
 0xac2   : > { %3062 = vrsqrt.f32 %v1560_v39  ;;  %v1559_v34 = vmul.f32 0.03125, %v1557_v40 }
 0xac4   : > { %v1561_v35 = vadd.f32 1e-05, %v1559_v34 }
 0xac6   : > { %3064 = vrsqrt.f32 %v1561_v35 }
 0xacf   : > { %v3063_v41 = vpop.eup %3062 }
 0xad0   : > { %v1564_v44 = vmul.f32 %v3063_v41, %v1548_v27 }
 0xad2   : > { %v1572_v45 = vmul.f32 %v2621_v43, %v1564_v44 }
 0xad3   : > { %v3065_v47 = vpop.eup %3064 }
 0xad4   : > { %v1565_v49 = vmul.f32 %v3065_v47, %v1549_v31  ;;  %v1580_v51 = vadd.f32 %v2622_v48, %v1572_v45 }
 0xad6   : > { %v1573_v50 = vmul.f32 %v2621_v43, %v1565_v49  ;;  %v3667_v53 = vmul.f32 %v1580_v51, %v3624_v56 }
 0xad8   : > { %v1581_v52 = vadd.f32 %v2622_v48, %v1573_v50 }
 0xada   : > { %v3670_v54 = vmul.f32 %v1581_v52, %v3626_v57 }
 0xadc   : > { %v1584_v55 = vpack.c.bf16 %v3670_v54, %v3667_v53 }
 0xade   : > { %2842 = vmatmul.mubr.msk.bf16.vlgmr.msra.gmra.mxu1 %vm759_vm2, %v1584_v55 }
 0xadf   : > { %2847 = vmatprep.mubr.msk.bf16.mxu1 %vm3244_vm0, %v3243_v0 }
 0xb9e   : > { %v1647_v59 = vpop.f32.mrf.mxu1 }
 0xb9f   : > { %v1648_v60 = vadd.f32 %v2628_v58, %v1647_v59 }
 0xba0   : > { %v2843_v61 = vpop.f32.mrf.mxu1 }
 0xba1   : > { %v3680_v62 = vpack.c.bf16 %v1648_v60, %v1648_v60 }
 0xba2   : > { %v1650_v63 = vpop.f32.mrf.mxu1 }
 0xba3   : > { %v1651_v1 = vadd.f32 %v2628_v58, %v1650_v63  ;;  %1667 = vrot.lane.b32.xlu0 %v3680_v62, %s3246_s20 }
 0xba4   : > { %v2844_v2 = vpop.f32.mrf.mxu1 }
 0xba5   : > { %v3011_v3 = vpack.i.bf16 %v1651_v1, %v1648_v60  ;;  %v1663_v4 = vpack.c.bf16 %v1651_v1, %v1651_v1 }
 0xba7   : > { %3012 = vrot.lane.b32.xlu1 %v3011_v3, %s3245_s25  ;;  %s3172_s25 = sshll.u32 %s3249_s24, 4  ;;  %s3173_s25 = int_to_ptr.vmem [resolvable:$false] %s3172_s25 }
 0xbab   : > { %1716 = vrot.lane.b32.xlu1 %v1663_v4, %s3246_s20 }
 0xc15   : > { %v1668_v5 = vpop.permute.xlu0 %1667 }
 0xc16   : > { %v1673_v6 = vsel %vm686_vm1, %v1668_v5, 0 }
 0xc17   : > { %2846 = vmatpush3.bf16.xpose.msra.mxu1 %v1673_v6 }
 0xc18   : > { %2857 = vmatprep.subr.bf16.mxu1 %v3243_v0 }
 0xc19   : > { %v3013_v7 = vpop.permute.xlu1 %3012 }
 0xc1a   : > { %v3015_v8 = vunpack.i.h.bf16 %v3013_v7  ;;  %v3014_v9 = vunpack.i.l.bf16 %v3013_v7 }
 0xc1c   : > { %v3688_v10 = vpack.c.bf16 %v3015_v8, %v3015_v8  ;;  %v3690_v11 = vpack.c.bf16 %v3014_v9, %v3014_v9 }
 0xc1d   : > { %v1717_v12 = vpop.permute.xlu1 %1716 }
 0xc1e   : > { %v1722_v13 = vsel %vm686_vm1, %v1717_v12, 0  ;;  %2848 = vmatmul.mubr.msk.bf16.vlgmr.msra.gmra.mxu1 %vm686_vm1, %v3680_v62  ;;  %1814 = vrot.lane.b32.xlu0 %v3688_v10, %s3246_s20 }
 0xc1f   : > { %1765 = vrot.lane.b32.xlu1 %v3690_v11, %s3246_s20  ;;  %2852 = vmatpush3.bf16.xpose.msra.mxu0 %v1722_v13  ;;  %s2583_s20 = sshll.u32 %s641_s18, 4 }
 0xc20   : > { %2863 = vmatprep.subr.bf16.mxu0 %v3243_v0  ;;  %2859 = vmatprep.mubr.msk.bf16.mxu1 %vm3244_vm0, %v3243_v0  ;;  %s643_s26 = scalar_lea.vmem [#allocation8], %s2583_s20  ;;  %s3174_s20 = scalar_lea.vmem %s3173_s25, 512 }
 0xc21   : > { %s2456_s19 = sshll.u32 %s643_s26, 4  ;;  %s3830_s19 = int_to_ptr.vmem [resolvable:$true] %s2456_s19 }
 0xc22   : > { %s3168_s27 = scalar_lea.vmem %s3830_s19, 256  ;;  %p3175_p7 = scmp.lt.s32.totalorder %s3830_s19, %s3173_s25 }
 0xc23   : > { %p3169_p10 = scmp.ne.s32.totalorder %s3830_s19, %s3168_s27  ;;  %p3176_p8 = scmp.lt.s32.totalorder %s3174_s20, %s3168_s27 }
 0xc25   : > { %p3170_p2 = pnand %p3169_p10, %p3925_p12  ;;  %p3177_p11 = por %p3176_p8, %p3175_p7 }
 0xc26   : > { %2854 = vmatmul.mubr.msk.bf16.vlgmr.msra.gmra.mxu0 %vm686_vm1, %v1663_v4 }
 0xc27   : > { %2865 = vmatprep.mubr.msk.bf16.mxu0 %vm3244_vm0, %v3243_v0  ;;  %p3171_p4 = pneg %p3170_p2 }
 0xc29   : > { %p3178_p0 = pnand %p3177_p11, %p3171_p4 }
 0xc90   : > { %v1815_v14 = vpop.permute.xlu0 %1814 }
 0xc91   : > { %v1820_v15 = vsel %vm686_vm1, %v1815_v14, 0  ;;  %v1766_v18 = vpop.permute.xlu1 %1765 }
 0xc92   : > { %v1771_v19 = vsel %vm686_vm1, %v1766_v18, 0  ;;  %2864 = vmatpush3.bf16.xpose.msra.mxu0 %v1820_v15 }
 0xc93   : > { %2858 = vmatpush3.bf16.xpose.msra.mxu1 %v1771_v19  ;;  %2875 = vmatprep.subr.bf16.mxu0 %v3243_v0 }
 0xc94   : > { %2869 = vmatprep.subr.bf16.mxu1 %v3243_v0 }
 0xc99   : > { %2866 = vmatmul.mubr.msk.bf16.vlgmr.msra.gmra.mxu0 %vm686_vm1, %v3688_v10 }
 0xc9a   : > { %2860 = vmatmul.mubr.msk.bf16.vlgmr.msra.gmra.mxu1 %vm686_vm1, %v3690_v11  ;;  %2877 = vmatprep.mubr.msk.bf16.mxu0 %vm3244_vm0, %v3243_v0 }
 0xc9b   : > { %2871 = vmatprep.mubr.msk.bf16.mxu1 %vm3244_vm0, %v3243_v0 }
 0xcde   : > { %v1709_v20 = vpop.f32.mrf.mxu1 }
 0xcdf   : > { %v1710_v21 = vadd.f32 %v1709_v20, %v3538_v46 }
 0xce0   : > { %v2849_v22 = vpop.f32.mrf.mxu1 }
 0xce1   : > { %v1862_v23 = vsel %vm1012_vm3, %v1710_v21, -inf }
 0xce2   : > { %1863 = vmax.xlane.f32.xlu1 %v1862_v23  ;;  %v1712_v24 = vpop.f32.mrf.mxu1 }
 0xce4   : > { %v2850_v25 = vpop.f32.mrf.mxu1 }
 0xce6   : > { %v1758_v26 = vpop.f32.mrf.mxu0 }
 0xce7   : > { %v1759_v27 = vadd.f32 %v1758_v26, %v3535_v42 }
 0xce8   : > { %v2855_v28 = vpop.f32.mrf.mxu0 }
 0xce9   : > { %v1865_v29 = vsel %vm1012_vm3, %v1759_v27, -inf }
 0xcea   : > { %1866 = vmax.xlane.f32.xlu0 %v1865_v29  ;;  %v1761_v30 = vpop.f32.mrf.mxu0  ;;  %v3034_v29 = vld [vmem:[%s3882_s8 + $0x18] sm:$0xff]  }
 0xcec   : > { %v2856_v31 = vpop.f32.mrf.mxu0 }
 0xd59   : > { %v1856_v32 = vpop.f32.mrf.mxu0 }
 0xd5a   : > { %v1807_v33 = vpop.f32.mrf.mxu1  ;;  %v1857_v36 = vadd.f32 %v1856_v32, %v3535_v42 }
 0xd5b   : > { %v1808_v16 = vadd.f32 %v1807_v33, %v3538_v46  ;;  %v2867_v37 = vpop.f32.mrf.mxu0 }
 0xd5c   : > { %v2861_v38 = vpop.f32.mrf.mxu1  ;;  %v1871_v17 = vsel %vm1012_vm3, %v1857_v36, -inf }
 0xd5d   : > { %v1868_v39 = vsel %vm1012_vm3, %v1808_v16, -inf  ;;  %1872 = vmax.xlane.f32.xlu1 %v1871_v17  ;;  %v1859_v40 = vpop.f32.mrf.mxu0  ;;  %v3035_v17 = vld [vmem:[%s3882_s8 + $0x10] sm:$0xff]  }
 0xd5e   : > { %v1810_v34 = vpop.f32.mrf.mxu1  ;;  %1869 = vmax.xlane.f32.xlu0 %v1868_v39 }
 0xd5f   : > { %v2868_v35 = vpop.f32.mrf.mxu0 }
 0xd60   : > { %v2862_v41 = vpop.f32.mrf.mxu1 }
 0xd6b   : > { %v1864_v43 = vpop.xlane.xlu1 %1863 }
 0xd6c   : > { %v1874_v44 = vsub.f32 %v1710_v21, %v1864_v43 }
 0xd6e   : > { %1958 = vrot.lane.b32.xlu1 %v1663_v4, %s3247_s30  ;;  %v1878_v47 = vmul.f32 1.442695, %v1874_v44 }
 0xd73   : > { %v1867_v42 = vpop.xlane.xlu0 %1866 }
 0xd74   : > { %1910 = vrot.lane.b32.xlu0 %v3680_v62, %s3247_s30  ;;  %v1875_v46 = vsub.f32 %v1759_v27, %v1867_v42 }
 0xd76   : > { %v1880_v45 = vmul.f32 1.442695, %v1875_v46 }
 0xd78   : > { %3066 = vpow2.f32 %v1880_v45 }
 0xd79   : > { %3068 = vpow2.f32 %v1878_v47 }
 0xd85   : > { %v3067_v48 = vpop.eup %3066 }
 0xd86   : > { %v3069_v49 = vpop.eup %3068  ;;  %v1889_v50 = vsel %vm1012_vm3, %v3067_v48, 0.0 }
 0xd87   : > { %v1886_v51 = vsel %vm1012_vm3, %v3069_v49, 0.0 }
 0xd92   : > { %1890 = vadd.xlane.f32.xlu1 %v1889_v50 }
 0xd93   : > { %1887 = vadd.xlane.f32.xlu0 %v1886_v51 }
 0xde6   : > { %v1873_v52 = vpop.xlane.xlu1 %1872 }
 0xde7   : > { %v1870_v55 = vpop.xlane.xlu0 %1869  ;;  %v1877_v58 = vsub.f32 %v1857_v36, %v1873_v52  ;;  %v2645_v52 = vld [vmem:[%s3883_s9 + $0x1] ss:$0 sm:$0xff] }
 0xde8   : > { %v1876_v59 = vsub.f32 %v1808_v16, %v1870_v55 }
 0xde9   : > { %v1884_v60 = vmul.f32 1.442695, %v1877_v58 }
 0xdea   : > { %v1882_v61 = vmul.f32 1.442695, %v1876_v59  ;;  %v1959_v62 = vpop.permute.xlu1 %1958 }
 0xdeb   : > { %3070 = vpow2.f32 %v1884_v60  ;;  %v1911_v63 = vpop.permute.xlu0 %1910  ;;  %v1964_v1 = vsel %vm1066_vm4, %v1959_v62, 0 }
 0xdec   : > { %3072 = vpow2.f32 %v1882_v61  ;;  %v1916_v2 = vsel %vm1066_vm4, %v1911_v63, 0  ;;  %2876 = vmatpush3.bf16.msra.mxu0 %v1964_v1 }
 0xded   : > { %2870 = vmatpush3.bf16.msra.mxu1 %v1916_v2  ;;  %2887 = vmatprep.subr.bf16.mxu0 %v3243_v0 }
 0xdee   : > { %2881 = vmatprep.subr.bf16.mxu1 %v3243_v0 }
 0xdf8   : > { %v3071_v3 = vpop.eup %3070 }
 0xdf9   : > { %v3073_v4 = vpop.eup %3072  ;;  %v1895_v5 = vsel %vm1012_vm3, %v3071_v3, 0.0 }
 0xdfa   : > { %v1892_v6 = vsel %vm1012_vm3, %v3073_v4, 0.0  ;;  %1896 = vadd.xlane.f32.xlu1 %v1895_v5 }
 0xdfb   : > { %1893 = vadd.xlane.f32.xlu0 %v1892_v6 }
 0xe0b   : > { %2006 = vrot.lane.b32.xlu1 %v3690_v11, %s3247_s30 }
 0xe11   : > { %2054 = vrot.lane.b32.xlu0 %v3688_v10, %s3247_s30  ;;  %s2684_s30 = sshll.u32 %s3368_s0, 8  ;;  %s3834_s0 = scalar_lea.sflag [#allocation4], %s641_s18 }
 0xe12   : > { %s3828_s23 = scalar_lea.hbm %s3923_s29, %s2684_s30 }
 0xe1b   : > { %v1891_v7 = vpop.xlane.xlu1 %1890 }
 0xe1c   : > { %v1888_v8 = vpop.xlane.xlu0 %1887  ;;  %3074 = vrcp.f32 %v1891_v7 }
 0xe1d   : > { %3076 = vrcp.f32 %v1888_v8 }
 0xe29   : > { %v3075_v9 = vpop.eup %3074 }
 0xe2a   : > { %v3077_v12 = vpop.eup %3076  ;;  %v1901_v13 = vmul.f32 %v3075_v9, %v3067_v48 }
 0xe2b   : > { %v1899_v14 = vmul.f32 %v3077_v12, %v3069_v49 }
 0xe2c   : > { %v1907_v15 = vpack.c.bf16 %v1901_v13, %v1901_v13 }
 0xe2d   : > { %v1906_v18 = vpack.c.bf16 %v1899_v14, %v1899_v14 }
 0xe2e   : > { %2878 = vmatmul.mubr.msk.bf16.vlgmr.msra.gmra.mxu0 %vm1012_vm3, %v1907_v15  ;;  %v3037_v15 = vld [vmem:[%s3886_s12 + $0x10] sm:$0xff]  }
 0xe2f   : > { %2872 = vmatmul.mubr.msk.bf16.vlgmr.msra.gmra.mxu1 %vm1012_vm3, %v1906_v18  ;;  %2889 = vmatprep.mubr.msk.bf16.mxu0 %vm3244_vm0, %v3243_v0  ;;  %v3038_v18 = vld [vmem:[%s3888_s14 + $0x38] sm:$0xff]  }
 0xe30   : > { %2883 = vmatprep.mubr.msk.bf16.mxu1 %vm3244_vm0, %v3243_v0 }
 0xe83   : > { %v1897_v10 = vpop.xlane.xlu1 %1896 }
 0xe84   : > { %v1894_v11 = vpop.xlane.xlu0 %1893  ;;  %3078 = vrcp.f32 %v1897_v10 }
 0xe85   : > { %3080 = vrcp.f32 %v1894_v11 }
 0xe87   : > { %v2007_v19 = vpop.permute.xlu1 %2006 }
 0xe88   : > { %v2055_v20 = vpop.permute.xlu0 %2054  ;;  %v2012_v21 = vsel %vm1066_vm4, %v2007_v19, 0 }
 0xe89   : > { %v2060_v22 = vsel %vm1066_vm4, %v2055_v20, 0  ;;  %2882 = vmatpush3.bf16.msra.mxu1 %v2012_v21 }
 0xe8a   : > { %2888 = vmatpush3.bf16.msra.mxu0 %v2060_v22  ;;  %2893 = vmatprep.subr.bf16.mxu1 %v3243_v0 }
 0xe8b   : > { %2901 = vmatprep.subr.bf16.mxu0 %v3243_v0 }
 0xe91   : > { %v3079_v23 = vpop.eup %3078 }
 0xe92   : > { %v3081_v24 = vpop.eup %3080  ;;  %v1905_v25 = vmul.f32 %v3079_v23, %v3071_v3 }
 0xe93   : > { %v1903_v26 = vmul.f32 %v3081_v24, %v3073_v4  ;;  %v2651_v24 = vld [vmem:[%s3884_s10 + $0x1] ss:$0 sm:$0xff] }
 0xe94   : > { %v1909_v27 = vpack.c.bf16 %v1905_v25, %v1905_v25 }
 0xe95   : > { %v1908_v28 = vpack.c.bf16 %v1903_v26, %v1903_v26 }
 0xe96   : > { %2890 = vmatmul.mubr.msk.bf16.vlgmr.msra.gmra.mxu0 %vm1012_vm3, %v1909_v27 }
 0xe97   : > { %2884 = vmatmul.mubr.msk.bf16.vlgmr.msra.gmra.mxu1 %vm1012_vm3, %v1908_v28  ;;  %2905 = vmatprep.mubr.msk.bf16.mxu0 %vm3244_vm0, %v3243_v0  ;;  %v2652_v28 = vld [vmem:[%s3885_s11 + $0x1] ss:$0 sm:$0xff] }
 0xe98   : > { %2897 = vmatprep.mubr.msk.bf16.mxu1 %vm3244_vm0, %v3243_v0  ;;  %2894 = vmatpush3.bf16.msra.mxu1 %v3034_v29 }
 0xe99   : > { %2895 = vmatprep.subr.bf16.mxu1 %v3243_v0 }
 0xe9c   : > { %2896 = vmatpush3.bf16.msra.mxu1 %v3035_v17  ;;  %v3041_v17 = vld [vmem:[%s3888_s14 + $0x20] sm:$0xff]  }
 0xe9d   : > { %2909 = vmatprep.subr.bf16.mxu1 %v3243_v0 }
 0xeee   : > { %v2000_v30 = vpop.f32.mrf.mxu0 }
 0xeef   : > { %v1952_v31 = vpop.f32.mrf.mxu1 }
 0xef0   : > { %v2879_v32 = vpop.f32.mrf.mxu0 }
 0xef1   : > { %v2873_v33 = vpop.f32.mrf.mxu1 }
 0xef2   : > { %v2003_v36 = vpop.f32.mrf.mxu0 }
 0xef3   : > { %v1955_v16 = vpop.f32.mrf.mxu1 }
 0xef4   : > { %v2880_v37 = vpop.f32.mrf.mxu0 }
 0xef5   : > { %v2874_v38 = vpop.f32.mrf.mxu1  ;;  %v3039_v37 = vld [vmem:[%s3888_s14 + $0x30] sm:$0xff]  }
 0xef6   : > { %v3040_v38 = vld [vmem:[%s3888_s14 + $0x28] sm:$0xff]  }
 0xf56   : > { %v2096_v39 = vpop.f32.mrf.mxu0 }
 0xf57   : > { %v2048_v40 = vpop.f32.mrf.mxu1 }
 0xf58   : > { %v3016_v34 = vpack.i.bf16 %v2096_v39, %v2048_v40  ;;  %v2891_v35 = vpop.f32.mrf.mxu0  ;;  %v2657_v39 = vld [vmem:[#allocation5 + $0x1] ss:$0 sm:$0xff] }
 0xf59   : > { %v2885_v41 = vpop.f32.mrf.mxu1 }
 0xf5a   : > { %3017 = vrot.lane.b32.xlu1 %v3016_v34, %s3248_s21  ;;  %v2099_v42 = vpop.f32.mrf.mxu0 }
 0xf5b   : > { %v2051_v43 = vpop.f32.mrf.mxu1 }
 0xf5c   : > { %v2892_v46 = vpop.f32.mrf.mxu0 }
 0xf5d   : > { %v2886_v44 = vpop.f32.mrf.mxu1 }
 0xfcc   : > { %v3018_v45 = vpop.permute.xlu1 %3017 }
 0xfcd   : > { %v3020_v47 = vunpack.i.h.bf16 %v3018_v45  ;;  %v3019_v48 = vunpack.i.l.bf16 %v3018_v45 }
 0xfcf   : > { %v2111_v49 = vsel %vm686_vm1, %v2000_v30, %v3020_v47  ;;  %v2110_v50 = vsel %vm686_vm1, %v1952_v31, %v3019_v48  ;;  %v2669_v47 = vld [vmem:[#allocation7 + $0x1] ss:$0 sm:$0xff] }
 0xfd0   : > { %v2112_v51 = vpack.c.bf16 %v2111_v49, %v2110_v50 }
 0xfd2   : > { %2898 = vmatmul.mubr.msk.bf16.vlgmr.msra.gmra.mxu1 %vm759_vm2, %v2112_v51 }
 0xfd3   : > { %2917 = vmatprep.mubr.msk.bf16.mxu1 %vm3244_vm0, %v3243_v0  ;;  %2910 = vmatpush3.bf16.msra.mxu1 %v3038_v18 }
 0xfd4   : > { %2911 = vmatprep.subr.bf16.mxu1 %v3243_v0 }
 0xfd7   : > { %2912 = vmatpush3.bf16.msra.mxu1 %v3039_v37 }
 0xfd8   : > { %2913 = vmatprep.subr.bf16.mxu1 %v3243_v0 }
 0xfdb   : > { %2914 = vmatpush3.bf16.msra.mxu1 %v3040_v38 }
 0xfdc   : > { %2915 = vmatprep.subr.bf16.mxu1 %v3243_v0 }
 0xfdf   : > { %2916 = vmatpush3.bf16.msra.mxu1 %v3041_v17 }
0x1092   : > { %v2175_v55 = vpop.f32.mrf.mxu1 }
0x1093   : > { %v2176_v58 = vadd.f32 %v2645_v52, %v2175_v55 }
0x1094   : > { %v2899_v59 = vpop.f32.mrf.mxu1 }
0x1095   : > { %v2182_v60 = vadd.f32 %v2176_v58, %v3667_v53 }
0x1096   : > { %v2178_v61 = vpop.f32.mrf.mxu1 }
0x1097   : > { %v2179_v62 = vadd.f32 %v2645_v52, %v2178_v61  ;;  %v2188_v63 = vsel %vm759_vm2, %v2182_v60, 0.0 }
0x1098   : > { %2189 = vadd.xlane.f32.xlu0 %v2188_v63  ;;  %v2900_v1 = vpop.f32.mrf.mxu1 }
0x1099   : > { %v2183_v2 = vadd.f32 %v2179_v62, %v3670_v54  ;;  %v3036_v54 = vld [vmem:[%s3886_s12 + $0x18] sm:$0xff]  }
0x109a   : > { %2902 = vmatpush3.bf16.msra.mxu0 %v3036_v54 }
0x109b   : > { %v2191_v3 = vsel %vm759_vm2, %v2183_v2, 0.0  ;;  %2903 = vmatprep.subr.bf16.mxu0 %v3243_v0 }
0x109c   : > { %2192 = vadd.xlane.f32.xlu1 %v2191_v3 }
0x109e   : > { %2904 = vmatpush3.bf16.msra.mxu0 %v3037_v15  ;;  %v2677_v15 = vld [vmem:[%s3890_s16 + $0x1] ss:$0 sm:$0xff] }
0x1121   : > { %v2190_v4 = vpop.xlane.xlu0 %2189 }
0x1122   : > { %v2194_v5 = vmul.f32 0.03125, %v2190_v4 }
0x1124   : > { %v2196_v6 = vsub.f32 %v2182_v60, %v2194_v5 }
0x1125   : > { %v2193_v7 = vpop.xlane.xlu1 %2192 }
0x1126   : > { %v2195_v8 = vmul.f32 0.03125, %v2193_v7  ;;  %v2198_v9 = vmul.f32 %v2196_v6, %v2196_v6 }
0x1128   : > { %v2197_v12 = vsub.f32 %v2183_v2, %v2195_v8  ;;  %v2200_v53 = vsel %vm759_vm2, %v2198_v9, 0.0 }
0x1129   : > { %2201 = vadd.xlane.f32.xlu0 %v2200_v53 }
0x112a   : > { %v2199_v13 = vmul.f32 %v2197_v12, %v2197_v12 }
0x112c   : > { %v2203_v14 = vsel %vm759_vm2, %v2199_v13, 0.0 }
0x112d   : > { %2204 = vadd.xlane.f32.xlu0 %v2203_v14 }
0x11b2   : > { %v2202_v10 = vpop.xlane.xlu0 %2201 }
0x11b3   : > { %v2206_v11 = vmul.f32 0.03125, %v2202_v10  ;;  %v2678_v10 = vld [vmem:[%s3891_s17 + $0x1] ss:$0 sm:$0xff] }
0x11b5   : > { %v2208_v19 = vadd.f32 1e-05, %v2206_v11 }
0x11b6   : > { %v2205_v20 = vpop.xlane.xlu0 %2204 }
0x11b7   : > { %3082 = vrsqrt.f32 %v2208_v19  ;;  %v2207_v21 = vmul.f32 0.03125, %v2205_v20 }
0x11b9   : > { %v2209_v22 = vadd.f32 1e-05, %v2207_v21 }
0x11bb   : > { %3084 = vrsqrt.f32 %v2209_v22 }
0x11c4   : > { %v3083_v23 = vpop.eup %3082 }
0x11c5   : > { %v2212_v25 = vmul.f32 %v3083_v23, %v2196_v6 }
0x11c7   : > { %v2220_v26 = vmul.f32 %v2651_v24, %v2212_v25 }
0x11c8   : > { %v3085_v27 = vpop.eup %3084 }
0x11c9   : > { %v2213_v29 = vmul.f32 %v3085_v27, %v2197_v12  ;;  %v2228_v31 = vadd.f32 %v2652_v28, %v2220_v26 }
0x11cb   : > { %v2221_v30 = vmul.f32 %v2651_v24, %v2213_v29  ;;  %v2230_v33 = vmul.f32 %v2228_v31, %v3624_v56 }
0x11cd   : > { %v2229_v32 = vadd.f32 %v2652_v28, %v2221_v30 }
0x11cf   : > { %v2231_v36 = vmul.f32 %v2229_v32, %v3626_v57 }
0x11d1   : > { %v2232_v16 = vpack.c.bf16 %v2231_v36, %v2230_v33 }
0x11d3   : > { %2906 = vmatmul.mubr.msk.bf16.vlgmr.msra.gmra.mxu0 %vm759_vm2, %v2232_v16 }
0x1293   : > { %v2295_v40 = vpop.f32.mrf.mxu0 }
0x1294   : > { %v2296_v35 = vadd.f32 %v2657_v39, %v2295_v40 }
0x1295   : > { %v2907_v34 = vpop.f32.mrf.mxu0 }
0x1296   : > { %v2302_v46 = vmax.f32 %v2296_v35, 0.0 }
0x1297   : > { %v2298_v41 = vpop.f32.mrf.mxu0 }
0x1298   : > { %v2299_v42 = vadd.f32 %v2657_v39, %v2298_v41 }
0x1299   : > { %v2908_v43 = vpop.f32.mrf.mxu0 }
0x129a   : > { %v2303_v44 = vmax.f32 %v2299_v42, 0.0 }
0x129c   : > { %v2304_v45 = vpack.c.bf16 %v2303_v44, %v2302_v46 }
0x129e   : > { %2918 = vmatmul.mubr.msk.bf16.vlgmr.msra.gmra.mxu1 %vm1491_vm5, %v2304_v45 }
0x135e   : > { %v2383_v48 = vpop.f32.mrf.mxu1 }
0x135f   : > { %v2384_v0 = vadd.f32 %v2669_v47, %v2383_v48 }
0x1360   : > { %v2919_v49 = vpop.f32.mrf.mxu1 }
0x1361   : > { %v2390_v50 = vadd.f32 %v2384_v0, %v2230_v33 }
0x1362   : > { %v2386_v51 = vpop.f32.mrf.mxu1 }
0x1363   : > { %v2387_v52 = vadd.f32 %v2669_v47, %v2386_v51  ;;  %v2396_v55 = vsel %vm759_vm2, %v2390_v50, 0.0 }
0x1364   : > { %2397 = vadd.xlane.f32.xlu1 %v2396_v55  ;;  %v2920_v58 = vpop.f32.mrf.mxu1 }
0x1365   : > { %v2391_v59 = vadd.f32 %v2387_v52, %v2231_v36 }
0x1367   : > { %v2399_v60 = vsel %vm759_vm2, %v2391_v59, 0.0 }
0x1368   : > { %2400 = vadd.xlane.f32.xlu0 %v2399_v60 }
0x13ed   : > { %v2398_v61 = vpop.xlane.xlu1 %2397 }
0x13ee   : > { %v2402_v62 = vmul.f32 0.03125, %v2398_v61 }
0x13f0   : > { %v2404_v63 = vsub.f32 %v2390_v50, %v2402_v62 }
0x13f1   : > { %v2401_v1 = vpop.xlane.xlu0 %2400 }
0x13f2   : > { %v2403_v2 = vmul.f32 0.03125, %v2401_v1  ;;  %v2406_v3 = vmul.f32 %v2404_v63, %v2404_v63 }
0x13f4   : > { %v2405_v4 = vsub.f32 %v2391_v59, %v2403_v2  ;;  %v2408_v5 = vsel %vm759_vm2, %v2406_v3, 0.0 }
0x13f5   : > { %2409 = vadd.xlane.f32.xlu1 %v2408_v5 }
0x13f6   : > { %v2407_v6 = vmul.f32 %v2405_v4, %v2405_v4 }
0x13f8   : > { %v2411_v7 = vsel %vm759_vm2, %v2407_v6, 0.0 }
0x13f9   : > { %2412 = vadd.xlane.f32.xlu0 %v2411_v7 }
0x147e   : > { %v2410_v8 = vpop.xlane.xlu1 %2409 }
0x147f   : > { %v2414_v9 = vmul.f32 0.03125, %v2410_v8 }
0x1481   : > { %v2416_v12 = vadd.f32 1e-05, %v2414_v9 }
0x1482   : > { %v2413_v53 = vpop.xlane.xlu0 %2412 }
0x1483   : > { %3086 = vrsqrt.f32 %v2416_v12  ;;  %v2415_v13 = vmul.f32 0.03125, %v2413_v53 }
0x1485   : > { %v2417_v14 = vadd.f32 1e-05, %v2415_v13 }
0x1487   : > { %3088 = vrsqrt.f32 %v2417_v14 }
0x1490   : > { %v3087_v54 = vpop.eup %3086 }
0x1491   : > { %v2420_v18 = vmul.f32 %v3087_v54, %v2404_v63 }
0x1493   : > { %v2428_v11 = vmul.f32 %v2677_v15, %v2420_v18 }
0x1494   : > { %v3089_v19 = vpop.eup %3088 }
0x1495   : > { %v2436_v20 = vadd.f32 %v2678_v10, %v2428_v11  ;;  %v2421_v21 = vmul.f32 %v3089_v19, %v2405_v4 }
0x1497   : > { %v2438_v22 = vmul.f32 %v2436_v20, %v3624_v56  ;;  %v2429_v23 = vmul.f32 %v2677_v15, %v2421_v21 }
0x1499   : > { %v2437_v24 = vadd.f32 %v2678_v10, %v2429_v23  ;;  %2440 = vst.msk [vmem:[%s643_s26] sm:$0xff] %vm759_vm2, %v2438_v22 }
0x149b   : > { %v2439_v25 = vmul.f32 %v2437_v24, %v3626_v57 }
0x149d   : > { %2441 = vst.msk [vmem:[%s643_s26 + $0x8] sm:$0xff] %vm759_vm2, %v2439_v25 }
0x149e   : > { %3181 = shalt.err (!%p3178_p0)
}
0x149f   : > { %s3182_s18 = scalar_lea.hbm %s3828_s23, 256  ;;  %s3186_s22 = scalar_lea.hbm %s3924_s1, 512 }
0x14a0   : > { %p3183_p9 = scmp.ne.s32.totalorder %s3828_s23, %s3182_s18  ;;  %p3187_p3 = scmp.lt.s32.totalorder %s3828_s23, %s3924_s1 }
0x14a1   : > { %p3188_p5 = scmp.lt.s32.totalorder %s3186_s22, %s3182_s18 }
0x14a2   : > { %p3184_p1 = pnand %p3183_p9, %p3925_p12 }
0x14a3   : > { %p3189_p6 = por %p3188_p5, %p3187_p3 }
0x14a4   : > { %p3185_p13 = pneg %p3184_p1 }
0x14a6   : > { %p3190_p10 = pnand %p3189_p6, %p3185_p13 }
0x14a8   : > { %3193 = shalt.err (!%p3190_p10)
}
0x14a9   : > { %s3250_s27 = smov 128   ;;  %s3251_s24 = smov 8  }
0x14aa   : > { %2933 = dma.vmem_to_hbm [thread:$0]  (%p3925_p12), %s3830_s19, 256, %s3828_s23, %s3834_s0, %s3250_s27, %s3250_s27, %s3251_s24  }
0x14ab PF: > { %s3926_s25 = sld [smem:[#allocation14_spill]] }
0x14ac   : > { %s3927_s20 = sld [smem:[#allocation12_spill]] }
0x14ad   : > { %s3928_s30 = sld [smem:[#allocation17_spill]] }
0x14b1   : > { %p2955_p2 = scmp.ge.s32.totalorder %s3926_s25, 2 }
0x14b2   : > { %s2471_s26 = sand.u32 1, %s3927_s20  }
0x14b3   : > { %p3929_p4 = scmp.ne.s32.totalorder %s3928_s30, 0  ;;  %s2472_s18 = scalar_lea.sflag [#allocation4], %s2471_s26 }
0x14b5   : > { %p2946_p7 = pnand %p2955_p2, %p3929_p4 }
0x14b7   : > { %p2947_p8 = pneg %p2946_p7 }
0x14b9   : > { %3219 = dma.done.wait (%p2947_p8), %s2472_s18, 256  }
0x14ba   : > { %3221 = vsyncadd (%p2947_p8), %s2472_s18, 4294967040  ;;  %s3930_s30 = sld [smem:[#allocation15_spill]]  ;;  %s3933_s27 = smov %s3228_s28 }
0x14bb   : > { %s3931_s22 = sld [smem:[#allocation13_spill]] }
0x14bc   : > { %s3932_s29 = sld [smem:[#allocation16_spill]] }
0x14c0   : > { %p30_p11 = scmp.ge.s32.totalorder %s3930_s30, 4  }
0x14c1   : > { %s3934_s28 = smov %s3931_s22 }
0x14c2   :  { %32 = sbr.rel (!%p30_p11) target bundleno = 10 (0xa), region = 158 }
0x14c7   :  { %2477 = vsyncpa [#allocation3], 1 }
0x14c8   :  { %2479 = vsyncpa [#allocation3 + $0x1], 1 }
0x14c9   :  { %2480 = vsyncpa [#allocation6], 1 }
0x14ca   :  { %2481 = vsyncpa [#allocation4], 1 }
0x14cb   :  { %2483 = vsyncpa [#allocation4 + $0x1], 1 }

</bundles_post_ra>
